<compile_context>
chip_gen: v6e
topology: v6e:2x2x1
jax: 0.10.0
libtpu: 0.0.40
codegen_flags: <defaults>
</compile_context>

<pallas_src>
import functools

import jax
import jax.numpy as jnp
from jax.experimental import pallas as pl
from jax.experimental.pallas import tpu as pltpu


def _round_up(x, m):
    return (x + m - 1) // m * m


_VMEM_LIMIT_CACHE = []


def _vmem_limit():
    """Generation-aware VMEM budget (v5e/v6e: ~96 MiB, v7x: ~48 MiB)."""
    if not _VMEM_LIMIT_CACHE:
        try:
            cap = int(pltpu.get_tpu_info().vmem_capacity_bytes)
        except Exception:
            cap = 128 * 1024 * 1024
        _VMEM_LIMIT_CACHE.append(
            max(32 * 1024 * 1024, min(cap * 3 // 4, 100 * 1024 * 1024)))
    return _VMEM_LIMIT_CACHE[0]


def _pick_tm(m, max_tm=1024):
    """Largest row tile <= max_tm dividing m (full-dim or 8-multiple blocks only)."""
    if m <= max_tm:
        return m, m
    tm = (max_tm // 8) * 8
    while tm >= 8:
        if m % tm == 0:
            return tm, m
        tm -= 8
    tm = (max_tm // 8) * 8
    return tm, _round_up(m, tm)


# ----------------------------------------------------------------------------
# Pallas kernels
# ----------------------------------------------------------------------------
def _gemm_lrelu_kernel(p_ref, w_ref, o_ref, *, slope):
    # Layer 0: p_ref (tm, 48) bf16, w_ref (48, n_pad) bf16 -> o_ref (tm, n_pad) bf16
    y = jnp.dot(p_ref[...], w_ref[...], preferred_element_type=jnp.float32)
    o_ref[...] = jnp.where(y > 0, y, slope * y).astype(o_ref.dtype)


def _conv_taps_stats_kernel(xkh_ref, w_ref, y_ref, sum_ref, ssq_ref, *,
                            ho, wo, n_pad):
    # Layers 1-3 pass 1 (per image):
    #   xkh_ref: (1, 2*(ho+1), wo, kc) bf16, row index = dh*(ho+1) + r
    #   w_ref:   (4, kc, n_pad) bf16, first axis = kh = 2*a + dh
    #   y_ref:   (1, ho, wo, n_pad) bf16 pre-BN conv output
    #   sum_ref/ssq_ref: (1, 1, n_pad) f32 per-image partial batch statistics
    def body(i, carry):
        s, ss = carry
        acc = jnp.zeros((wo, n_pad), jnp.float32)
        for a in (0, 1):
            for dh in (0, 1):
                t = xkh_ref[0, dh * (ho + 1) + i + a]          # (wo, kc)
                acc = acc + jnp.dot(t, w_ref[2 * a + dh],
                                    preferred_element_type=jnp.float32)
        y_ref[0, i] = acc.astype(y_ref.dtype)
        s = s + jnp.sum(acc, axis=0, keepdims=True)
        ss = ss + jnp.sum(acc * acc, axis=0, keepdims=True)
        return s, ss

    init = (jnp.zeros((1, n_pad), jnp.float32),
            jnp.zeros((1, n_pad), jnp.float32))
    s, ss = jax.lax.fori_loop(0, ho, body, init)
    sum_ref[...] = s.reshape(1, 1, n_pad)
    ssq_ref[...] = ss.reshape(1, 1, n_pad)


def _bn_lrelu_kernel(y_ref, scale_ref, shift_ref, o_ref, *, slope):
    # Layers 1-3 pass 2: per-channel affine (folded BN) + LeakyReLU, cast at store.
    y = y_ref[...].astype(jnp.float32)
    yn = y * scale_ref[...] + shift_ref[...]
    o_ref[...] = jnp.where(yn > 0, yn, slope * yn).astype(o_ref.dtype)


# ----------------------------------------------------------------------------
# pallas_call wrappers
# ----------------------------------------------------------------------------
def _conv0_pallas(patches, w_mat, *, tm):
    m_pad, k = patches.shape
    n_pad = w_mat.shape[1]
    return pl.pallas_call(
        functools.partial(_gemm_lrelu_kernel, slope=0.2),
        out_shape=jax.ShapeDtypeStruct((m_pad, n_pad), jnp.bfloat16),
        grid=(m_pad // tm,),
        in_specs=[
            pl.BlockSpec((tm, k), lambda i: (i, 0)),       # K = 48, full dim (no pad)
            pl.BlockSpec((k, n_pad), lambda i: (0, 0)),
        ],
        out_specs=pl.BlockSpec((tm, n_pad), lambda i: (i, 0)),
        compiler_params=pltpu.CompilerParams(
            dimension_semantics=("parallel",),
            vmem_limit_bytes=_vmem_limit()),
    )(patches, w_mat)


def _conv_taps_pallas(xkh, wk, *, ho, wo, n_pad):
    b, _, _, kc = xkh.shape
    kern = functools.partial(_conv_taps_stats_kernel, ho=ho, wo=wo, n_pad=n_pad)
    return pl.pallas_call(
        kern,
        out_shape=(jax.ShapeDtypeStruct((b, ho, wo, n_pad), jnp.bfloat16),
                   jax.ShapeDtypeStruct((b, 1, n_pad), jnp.float32),
                   jax.ShapeDtypeStruct((b, 1, n_pad), jnp.float32)),
        grid=(b,),
        in_specs=[
            pl.BlockSpec((1, 2 * (ho + 1), wo, kc), lambda i: (i, 0, 0, 0)),
            pl.BlockSpec((4, kc, n_pad), lambda i: (0, 0, 0)),
        ],
        out_specs=(
            pl.BlockSpec((1, ho, wo, n_pad), lambda i: (i, 0, 0, 0)),
            pl.BlockSpec((1, 1, n_pad), lambda i: (i, 0, 0)),
            pl.BlockSpec((1, 1, n_pad), lambda i: (i, 0, 0)),
        ),
        compiler_params=pltpu.CompilerParams(
            dimension_semantics=("parallel",),
            vmem_limit_bytes=_vmem_limit()),
    )(xkh, wk)


def _bn_lrelu_pallas(y, scale, shift, *, out_dtype):
    b, ho, wo, n_pad = y.shape
    return pl.pallas_call(
        functools.partial(_bn_lrelu_kernel, slope=0.2),
        out_shape=jax.ShapeDtypeStruct((b, ho, wo, n_pad), out_dtype),
        grid=(b,),
        in_specs=[
            pl.BlockSpec((1, ho, wo, n_pad), lambda i: (i, 0, 0, 0)),
            pl.BlockSpec((1, n_pad), lambda i: (0, 0)),
            pl.BlockSpec((1, n_pad), lambda i: (0, 0)),
        ],
        out_specs=pl.BlockSpec((1, ho, wo, n_pad), lambda i: (i, 0, 0, 0)),
        compiler_params=pltpu.CompilerParams(
            dimension_semantics=("parallel",),
            vmem_limit_bytes=_vmem_limit()),
    )(y, scale, shift)


# ----------------------------------------------------------------------------
# Plain-JAX layout glue (single-pass rearrangements, fused by XLA)
# ----------------------------------------------------------------------------
def _im2col_l0(x):
    # Layer 0 only (C_in = 3): (B, H, W, 3) -> (B*Ho*Wo, 48), feature order (kh, kw, c).
    b, h, w, c = x.shape
    ho, wo = h // 2, w // 2
    xp = jnp.pad(x, ((0, 0), (1, 1), (1, 1), (0, 0)))
    cols = [xp[:, kh:kh + 2 * ho:2, kw:kw + 2 * wo:2, :]
            for kh in range(4) for kw in range(4)]
    patches = jnp.stack(cols, axis=3).reshape(b * ho * wo, 16 * c)
    return patches, (b, ho, wo)


def _prep_taps(x):
    # Layers 1-3: (B, H, W, C) -> xkh (B, 2*(Ho+1), Wo, 4*C) with
    #   xkh[b, dh*(Ho+1)+r, j, kw*C+c] = x_pad[b, 2r+dh, 2j+kw, c]   (~2x the activation)
    b, h, w, c = x.shape
    ho, wo = h // 2, w // 2
    xp = jnp.pad(x, ((0, 0), (1, 1), (1, 1), (0, 0)))           # (B, H+2, W+2, C)
    xk = jnp.stack([xp[:, :, kw:kw + 2 * wo:2, :] for kw in range(4)], axis=3)
    xkh = xk.reshape(b, ho + 1, 2, wo, 4, c).transpose(0, 2, 1, 3, 4, 5)
    xkh = xkh.reshape(b, 2 * (ho + 1), wo, 4 * c)
    return xkh, (b, ho, wo)


# ----------------------------------------------------------------------------
# Parameters
# ----------------------------------------------------------------------------
def init_d_patchgan_params(key, ndf):
    """Raw torch-layout parameters (OIHW conv weights, per-channel BN affine)."""
    chans = [3, ndf, ndf * 2, ndf * 4, ndf * 8]
    params = []
    for li in range(4):
        key, kw, kg, kb = jax.random.split(key, 4)
        c_in, c_out = chans[li], chans[li + 1]
        w = 0.1 * jax.random.normal(kw, (c_out, c_in, 4, 4), jnp.float32)
        gamma = 1.0 + 0.1 * jax.random.normal(kg, (c_out,), jnp.float32)
        beta = 0.1 * jax.random.normal(kb, (c_out,), jnp.float32)
        params.append({"w": w, "gamma": gamma, "beta": beta})
    return params


def prepare_params(params):
    """Hoisted out of the forward path: reorder, lane-pad (N only) and bf16-cast."""
    prepped = []
    for li, p in enumerate(params):
        c_out, c_in, _, _ = p["w"].shape
        n_pad = _round_up(c_out, 128)
        if li == 0:
            # (O, I, kh, kw) -> (kh*kw*I, O): row order (kh, kw, c)
            w = jnp.transpose(p["w"], (2, 3, 1, 0)).reshape(16 * c_in, c_out)
            w = jnp.pad(w, ((0, 0), (0, n_pad - c_out)))
        else:
            # (O, I, kh, kw) -> (kh, kw*I, O): lane order of xkh is (kw, c)
            w = jnp.transpose(p["w"], (2, 3, 1, 0)).reshape(4, 4 * c_in, c_out)
            w = jnp.pad(w, ((0, 0), (0, 0), (0, n_pad - c_out)))
        gamma = jnp.pad(p["gamma"], (0, n_pad - c_out)).reshape(1, n_pad)
        beta = jnp.pad(p["beta"], (0, n_pad - c_out)).reshape(1, n_pad)
        prepped.append({"w": w.astype(jnp.bfloat16),
                        "gamma": gamma.astype(jnp.float32),
                        "beta": beta.astype(jnp.float32)})
    return prepped


# ----------------------------------------------------------------------------
# D_PATCHGAN forward
# ----------------------------------------------------------------------------
@functools.partial(jax.jit, static_argnames=("ndf",))
def d_patchgan_forward(prep, x_nchw, *, ndf):
    # x_nchw: (B, 3, H, W) -> x_code4: (B, ndf*8, H/16, W/16)
    chans = [3, ndf, ndf * 2, ndf * 4, ndf * 8]
    x = jnp.transpose(x_nchw, (0, 2, 3, 1)).astype(jnp.bfloat16)   # NHWC, bf16
    for li in range(4):
        p = prep[li]
        c_out = chans[li + 1]
        n_pad = p["w"].shape[-1]
        if li == 0:
            patches, (b, ho, wo) = _im2col_l0(x)
            m = b * ho * wo
            tm, m_pad = _pick_tm(m, 1024)
            if m_pad > m:
                patches = jnp.pad(patches, ((0, m_pad - m), (0, 0)))
            y = _conv0_pallas(patches, p["w"], tm=tm)               # bf16, lrelu fused
            x = y[:m].reshape(b, ho, wo, n_pad)[..., :c_out]
        else:
            xkh, (b, ho, wo) = _prep_taps(x)
            y, s, ss = _conv_taps_pallas(xkh, p["w"], ho=ho, wo=wo, n_pad=n_pad)
            # tiny stats combine in JAX (exact batch statistics over B*Ho*Wo rows)
            m_rows = float(b * ho * wo)
            tot = jnp.sum(s, axis=0)                                # (1, n_pad) f32
            tot2 = jnp.sum(ss, axis=0)
            mean = tot / m_rows
            var = jnp.maximum(tot2 / m_rows - mean * mean, 0.0)
            scale = p["gamma"] * jax.lax.rsqrt(var + 1e-5)
            shift = p["beta"] - mean * scale
            out_dtype = jnp.float32 if li == 3 else jnp.bfloat16
            yact = _bn_lrelu_pallas(y, scale, shift, out_dtype=out_dtype)
            x = yact[..., :c_out]          # fuses into the next layer's tap rearrange
    return jnp.transpose(x, (0, 3, 1, 2))  # NCHW (f32)


# ----------------------------------------------------------------------------
# Pure-JAX f32 reference (for correctness check)
# ----------------------------------------------------------------------------
def _ref_forward(params, x_nchw):
    x = x_nchw.astype(jnp.float32)
    for li, p in enumerate(params):
        y = jax.lax.conv_general_dilated(
            x, p["w"], window_strides=(2, 2), padding=((1, 1), (1, 1)),
            dimension_numbers=("NCHW", "OIHW", "NCHW"))
        if li != 0:
            mean = jnp.mean(y, axis=(0, 2, 3), keepdims=True)
            var = jnp.mean((y - mean) ** 2, axis=(0, 2, 3), keepdims=True)
            g = p["gamma"].reshape(1, -1, 1, 1)
            b = p["beta"].reshape(1, -1, 1, 1)
            y = (y - mean) * jax.lax.rsqrt(var + 1e-5) * g + b
        x = jnp.where(y > 0, y, 0.2 * y)
    return x


if __name__ == "__main__":
    B, H, W = 2, 32, 32
    ndf = 8

    key = jax.random.PRNGKey(0)
    key, kx = jax.random.split(key)
    x = jax.random.normal(kx, (B, 3, H, W), jnp.float32)

    params = init_d_patchgan_params(key, ndf)
    prep = prepare_params(params)

    out = jax.block_until_ready(d_patchgan_forward(prep, x, ndf=ndf))
    assert out.shape == (B, ndf * 8, H // 16, W // 16), out.shape

    ref = jax.block_until_ready(_ref_forward(params, x))
    # bf16 GEMM operands + bf16 inter-pass activations (f32 accumulation / BN math)
    err = float(jnp.max(jnp.abs(out - ref)))
    assert jnp.allclose(out, ref, rtol=6e-2, atol=6e-2), err

    print("KERNEL_OK")
</pallas_src>

<mosaic_0001>
module attributes {stable_mosaic.version = 11 : i64} {
  func.func @_gemm_lrelu_kernel(%arg0: i32, %arg1: memref<512x48xbf16, #tpu.memory_space<vmem>>, %arg2: memref<48x128xbf16, #tpu.memory_space<vmem>>, %arg3: memref<512x128xbf16, #tpu.memory_space<vmem>>) attributes {dimension_semantics = [#tpu.dimension_semantics<parallel>], iteration_bounds = array<i64: 1>, scalar_prefetch = 0 : i64, scratch_operands = 0 : i64, tpu.core_type = #tpu.core_type<tc>, window_params = [{transform_indices = @transform_0, window_bounds = array<i64: 512, 48>}, {pipeline_mode = #tpu.pipeline_mode<synchronous>, transform_indices = @transform_1, window_bounds = array<i64: 48, 128>}, {transform_indices = @transform_2, window_bounds = array<i64: 512, 128>}]} {
    %c0 = arith.constant 0 : index
    %c0_0 = arith.constant 0 : index
    %0 = vector.load %arg1[%c0, %c0_0] : memref<512x48xbf16, #tpu.memory_space<vmem>>, vector<512x48xbf16>
    %c0_1 = arith.constant 0 : index
    %c0_2 = arith.constant 0 : index
    %1 = vector.load %arg2[%c0_1, %c0_2] : memref<48x128xbf16, #tpu.memory_space<vmem>>, vector<48x128xbf16>
    %cst = arith.constant dense<0.000000e+00> : vector<512x128xf32>
    %2 = tpu.matmul %0, %1, %cst {dimension_numbers = #tpu.dot_dimension_numbers<[1], [0], [0], [1], [0, 0, 1, 1], [], []>} : vector<512x48xbf16>, vector<48x128xbf16>, vector<512x128xf32> -> vector<512x128xf32>
    %cst_3 = arith.constant 0.000000e+00 : f32
    %3 = vector.broadcast %cst_3 : f32 to vector<512x128xf32>
    %4 = arith.cmpf ogt, %2, %3 : vector<512x128xf32>
    %cst_4 = arith.constant 2.000000e-01 : f32
    %5 = vector.broadcast %cst_4 : f32 to vector<512x128xf32>
    %6 = arith.mulf %5, %2 : vector<512x128xf32>
    %7 = arith.select %4, %2, %6 : vector<512x128xi1>, vector<512x128xf32>
    %8 = arith.truncf %7 : vector<512x128xf32> to vector<512x128xbf16>
    %c0_5 = arith.constant 0 : index
    %c0_6 = arith.constant 0 : index
    %9 = vector.load %arg3[%c0_5, %c0_6] : memref<512x128xbf16, #tpu.memory_space<vmem>>, vector<512x128xbf16>
    tpu.vector_store %arg3[%c0_5, %c0_6], %8 {strides = array<i32>} : memref<512x128xbf16, #tpu.memory_space<vmem>>, vector<512x128xbf16>,
    return
  }
  func.func @transform_0(%arg0: i32) -> (i32, i32) {
    %c0_i32 = arith.constant 0 : i32
    %c0_i32_0 = arith.constant 0 : i32
    return %arg0, %c0_i32 : i32, i32
  }
  func.func @transform_1(%arg0: i32) -> (i32, i32) {
    %c0_i32 = arith.constant 0 : i32
    %c0_i32_0 = arith.constant 0 : i32
    %c0_i32_1 = arith.constant 0 : i32
    return %c0_i32, %c0_i32_0 : i32, i32
  }
  func.func @transform_2(%arg0: i32) -> (i32, i32) {
    %c0_i32 = arith.constant 0 : i32
    %c0_i32_0 = arith.constant 0 : i32
    return %arg0, %c0_i32 : i32, i32
  }
}

module attributes {stable_mosaic.version = 11 : i64} {
  func.func @_conv_taps_stats_kernel(%arg0: i32, %arg1: memref<1x18x8x32xbf16, #tpu.memory_space<vmem>>, %arg2: memref<4x32x128xbf16, #tpu.memory_space<vmem>>, %arg3: memref<1x8x8x128xbf16, #tpu.memory_space<vmem>>, %arg4: memref<1x1x128xf32, #tpu.memory_space<vmem>>, %arg5: memref<1x1x128xf32, #tpu.memory_space<vmem>>) attributes {dimension_semantics = [#tpu.dimension_semantics<parallel>], iteration_bounds = array<i64: 2>, scalar_prefetch = 0 : i64, scratch_operands = 0 : i64, tpu.core_type = #tpu.core_type<tc>, window_params = [{transform_indices = @transform_0, window_bounds = array<i64: 1, 18, 8, 32>}, {pipeline_mode = #tpu.pipeline_mode<synchronous>, transform_indices = @transform_1, window_bounds = array<i64: 4, 32, 128>}, {transform_indices = @transform_2, window_bounds = array<i64: 1, 8, 8, 128>}, {transform_indices = @transform_3, window_bounds = array<i64: 1, 1, 128>}, {transform_indices = @transform_4, window_bounds = array<i64: 1, 1, 128>}]} {
    %cst = arith.constant 0.000000e+00 : f32
    %0 = vector.broadcast %cst : f32 to vector<1x128xf32>
    %cst_0 = arith.constant 0.000000e+00 : f32
    %1 = vector.broadcast %cst_0 : f32 to vector<1x128xf32>
    %c0_i32 = arith.constant 0 : i32
    %c8_i32 = arith.constant 8 : i32
    %2 = arith.addi %c0_i32, %c8_i32 : i32
    %c1_i32 = arith.constant 1 : i32
    %3:2 = scf.for %arg6 = %c0_i32 to %2 step %c1_i32 iter_args(%arg7 = %0, %arg8 = %1) -> (vector<1x128xf32>, vector<1x128xf32>)  : i32 {
      %cst_7 = arith.constant 0.000000e+00 : f32
      %8 = vector.broadcast %cst_7 : f32 to vector<8x128xf32>
      %c0_i32_8 = arith.constant 0 : i32
      %9 = arith.addi %c0_i32_8, %arg6 : i32
      %c0_i32_9 = arith.constant 0 : i32
      %10 = arith.addi %9, %c0_i32_9 : i32
      %c0_10 = arith.constant 0 : index
      %11 = arith.index_cast %10 : i32 to index
      %c0_11 = arith.constant 0 : index
      %c0_12 = arith.constant 0 : index
      %12 = vector.load %arg1[%c0_10, %11, %c0_11, %c0_12] : memref<1x18x8x32xbf16, #tpu.memory_space<vmem>>, vector<1x1x8x32xbf16>
      %13 = vector.shape_cast %12 : vector<1x1x8x32xbf16> to vector<8x32xbf16>
      %c0_13 = arith.constant 0 : index
      %c0_14 = arith.constant 0 : index
      %c0_15 = arith.constant 0 : index
      %14 = vector.load %arg2[%c0_13, %c0_14, %c0_15] : memref<4x32x128xbf16, #tpu.memory_space<vmem>>, vector<1x32x128xbf16>
      %15 = vector.shape_cast %14 : vector<1x32x128xbf16> to vector<32x128xbf16>
      %cst_16 = arith.constant dense<0.000000e+00> : vector<8x128xf32>
      %16 = tpu.matmul %13, %15, %cst_16 {dimension_numbers = #tpu.dot_dimension_numbers<[1], [0], [0], [1], [0, 0, 1, 1], [], []>} : vector<8x32xbf16>, vector<32x128xbf16>, vector<8x128xf32> -> vector<8x128xf32>
      %17 = arith.addf %8, %16 : vector<8x128xf32>
      %c9_i32 = arith.constant 9 : i32
      %18 = arith.addi %c9_i32, %arg6 : i32
      %c0_i32_17 = arith.constant 0 : i32
      %19 = arith.addi %18, %c0_i32_17 : i32
      %c0_18 = arith.constant 0 : index
      %20 = arith.index_cast %19 : i32 to index
      %c0_19 = arith.constant 0 : index
      %c0_20 = arith.constant 0 : index
      %21 = vector.load %arg1[%c0_18, %20, %c0_19, %c0_20] : memref<1x18x8x32xbf16, #tpu.memory_space<vmem>>, vector<1x1x8x32xbf16>
      %22 = vector.shape_cast %21 : vector<1x1x8x32xbf16> to vector<8x32xbf16>
      %c1 = arith.constant 1 : index
      %c0_21 = arith.constant 0 : index
      %c0_22 = arith.constant 0 : index
      %23 = vector.load %arg2[%c1, %c0_21, %c0_22] : memref<4x32x128xbf16, #tpu.memory_space<vmem>>, vector<1x32x128xbf16>
      %24 = vector.shape_cast %23 : vector<1x32x128xbf16> to vector<32x128xbf16>
      %cst_23 = arith.constant dense<0.000000e+00> : vector<8x128xf32>
      %25 = tpu.matmul %22, %24, %cst_23 {dimension_numbers = #tpu.dot_dimension_numbers<[1], [0], [0], [1], [0, 0, 1, 1], [], []>} : vector<8x32xbf16>, vector<32x128xbf16>, vector<8x128xf32> -> vector<8x128xf32>
      %26 = arith.addf %17, %25 : vector<8x128xf32>
      %c0_i32_24 = arith.constant 0 : i32
      %27 = arith.addi %c0_i32_24, %arg6 : i32
      %c1_i32_25 = arith.constant 1 : i32
      %28 = arith.addi %27, %c1_i32_25 : i32
      %c0_26 = arith.constant 0 : index
      %29 = arith.index_cast %28 : i32 to index
      %c0_27 = arith.constant 0 : index
      %c0_28 = arith.constant 0 : index
      %30 = vector.load %arg1[%c0_26, %29, %c0_27, %c0_28] : memref<1x18x8x32xbf16, #tpu.memory_space<vmem>>, vector<1x1x8x32xbf16>
      %31 = vector.shape_cast %30 : vector<1x1x8x32xbf16> to vector<8x32xbf16>
      %c2 = arith.constant 2 : index
      %c0_29 = arith.constant 0 : index
      %c0_30 = arith.constant 0 : index
      %32 = vector.load %arg2[%c2, %c0_29, %c0_30] : memref<4x32x128xbf16, #tpu.memory_space<vmem>>, vector<1x32x128xbf16>
      %33 = vector.shape_cast %32 : vector<1x32x128xbf16> to vector<32x128xbf16>
      %cst_31 = arith.constant dense<0.000000e+00> : vector<8x128xf32>
      %34 = tpu.matmul %31, %33, %cst_31 {dimension_numbers = #tpu.dot_dimension_numbers<[1], [0], [0], [1], [0, 0, 1, 1], [], []>} : vector<8x32xbf16>, vector<32x128xbf16>, vector<8x128xf32> -> vector<8x128xf32>
      %35 = arith.addf %26, %34 : vector<8x128xf32>
      %c9_i32_32 = arith.constant 9 : i32
      %36 = arith.addi %c9_i32_32, %arg6 : i32
      %c1_i32_33 = arith.constant 1 : i32
      %37 = arith.addi %36, %c1_i32_33 : i32
      %c0_34 = arith.constant 0 : index
      %38 = arith.index_cast %37 : i32 to index
      %c0_35 = arith.constant 0 : index
      %c0_36 = arith.constant 0 : index
      %39 = vector.load %arg1[%c0_34, %38, %c0_35, %c0_36] : memref<1x18x8x32xbf16, #tpu.memory_space<vmem>>, vector<1x1x8x32xbf16>
      %40 = vector.shape_cast %39 : vector<1x1x8x32xbf16> to vector<8x32xbf16>
      %c3 = arith.constant 3 : index
      %c0_37 = arith.constant 0 : index
      %c0_38 = arith.constant 0 : index
      %41 = vector.load %arg2[%c3, %c0_37, %c0_38] : memref<4x32x128xbf16, #tpu.memory_space<vmem>>, vector<1x32x128xbf16>
      %42 = vector.shape_cast %41 : vector<1x32x128xbf16> to vector<32x128xbf16>
      %cst_39 = arith.constant dense<0.000000e+00> : vector<8x128xf32>
      %43 = tpu.matmul %40, %42, %cst_39 {dimension_numbers = #tpu.dot_dimension_numbers<[1], [0], [0], [1], [0, 0, 1, 1], [], []>} : vector<8x32xbf16>, vector<32x128xbf16>, vector<8x128xf32> -> vector<8x128xf32>
      %44 = arith.addf %35, %43 : vector<8x128xf32>
      %45 = arith.truncf %44 : vector<8x128xf32> to vector<8x128xbf16>
      %c0_40 = arith.constant 0 : index
      %46 = arith.index_cast %arg6 : i32 to index
      %c0_41 = arith.constant 0 : index
      %c0_42 = arith.constant 0 : index
      %47 = vector.load %arg3[%c0_40, %46, %c0_41, %c0_42] : memref<1x8x8x128xbf16, #tpu.memory_space<vmem>>, vector<1x1x8x128xbf16>
      %48 = vector.shape_cast %47 : vector<1x1x8x128xbf16> to vector<8x128xbf16>
      %49 = vector.shape_cast %45 : vector<8x128xbf16> to vector<1x1x8x128xbf16>
      tpu.vector_store %arg3[%c0_40, %46, %c0_41, %c0_42], %49 {strides = array<i32>} : memref<1x8x8x128xbf16, #tpu.memory_space<vmem>>, vector<1x1x8x128xbf16>,
      %cst_43 = arith.constant dense<0.000000e+00> : vector<128xf32>
      %50 = vector.multi_reduction <add>, %44, %cst_43 [0] : vector<8x128xf32> to vector<128xf32>
      %51 = vector.shape_cast %50 : vector<128xf32> to vector<1x128xf32>
      %52 = arith.addf %arg7, %51 : vector<1x128xf32>
      %53 = arith.mulf %44, %44 : vector<8x128xf32>
      %cst_44 = arith.constant dense<0.000000e+00> : vector<128xf32>
      %54 = vector.multi_reduction <add>, %53, %cst_44 [0] : vector<8x128xf32> to vector<128xf32>
      %55 = vector.shape_cast %54 : vector<128xf32> to vector<1x128xf32>
      %56 = arith.addf %arg8, %55 : vector<1x128xf32>
      scf.yield %52, %56 : vector<1x128xf32>, vector<1x128xf32>
    }
    %c8_i32_1 = arith.constant 8 : i32
    %4 = vector.shape_cast %3#0 : vector<1x128xf32> to vector<1x1x128xf32>
    %c0 = arith.constant 0 : index
    %c0_2 = arith.constant 0 : index
    %c0_3 = arith.constant 0 : index
    %5 = vector.load %arg4[%c0, %c0_2, %c0_3] : memref<1x1x128xf32, #tpu.memory_space<vmem>>, vector<1x1x128xf32>
    tpu.vector_store %arg4[%c0, %c0_2, %c0_3], %4 {strides = array<i32>} : memref<1x1x128xf32, #tpu.memory_space<vmem>>, vector<1x1x128xf32>,
    %6 = vector.shape_cast %3#1 : vector<1x128xf32> to vector<1x1x128xf32>
    %c0_4 = arith.constant 0 : index
    %c0_5 = arith.constant 0 : index
    %c0_6 = arith.constant 0 : index
    %7 = vector.load %arg5[%c0_4, %c0_5, %c0_6] : memref<1x1x128xf32, #tpu.memory_space<vmem>>, vector<1x1x128xf32>
    tpu.vector_store %arg5[%c0_4, %c0_5, %c0_6], %6 {strides = array<i32>} : memref<1x1x128xf32, #tpu.memory_space<vmem>>, vector<1x1x128xf32>,
    return
  }
  func.func @transform_0(%arg0: i32) -> (i32, i32, i32, i32) {
    %c0_i32 = arith.constant 0 : i32
    %c0_i32_0 = arith.constant 0 : i32
    %c0_i32_1 = arith.constant 0 : i32
    %c0_i32_2 = arith.constant 0 : i32
    return %arg0, %c0_i32, %c0_i32_0, %c0_i32_1 : i32, i32, i32, i32
  }
  func.func @transform_1(%arg0: i32) -> (i32, i32, i32) {
    %c0_i32 = arith.constant 0 : i32
    %c0_i32_0 = arith.constant 0 : i32
    %c0_i32_1 = arith.constant 0 : i32
    %c0_i32_2 = arith.constant 0 : i32
    return %c0_i32, %c0_i32_0, %c0_i32_1 : i32, i32, i32
  }
  func.func @transform_2(%arg0: i32) -> (i32, i32, i32, i32) {
    %c0_i32 = arith.constant 0 : i32
    %c0_i32_0 = arith.constant 0 : i32
    %c0_i32_1 = arith.constant 0 : i32
    %c0_i32_2 = arith.constant 0 : i32
    return %arg0, %c0_i32, %c0_i32_0, %c0_i32_1 : i32, i32, i32, i32
  }
  func.func @transform_3(%arg0: i32) -> (i32, i32, i32) {
    %c0_i32 = arith.constant 0 : i32
    %c0_i32_0 = arith.constant 0 : i32
    %c0_i32_1 = arith.constant 0 : i32
    return %arg0, %c0_i32, %c0_i32_0 : i32, i32, i32
  }
  func.func @transform_4(%arg0: i32) -> (i32, i32, i32) {
    %c0_i32 = arith.constant 0 : i32
    %c0_i32_0 = arith.constant 0 : i32
    %c0_i32_1 = arith.constant 0 : i32
    return %arg0, %c0_i32, %c0_i32_0 : i32, i32, i32
  }
}

module attributes {stable_mosaic.version = 11 : i64} {
  func.func @_bn_lrelu_kernel(%arg0: i32, %arg1: memref<1x8x8x128xbf16, #tpu.memory_space<vmem>>, %arg2: memref<1x128xf32, #tpu.memory_space<vmem>>, %arg3: memref<1x128xf32, #tpu.memory_space<vmem>>, %arg4: memref<1x8x8x128xbf16, #tpu.memory_space<vmem>>) attributes {dimension_semantics = [#tpu.dimension_semantics<parallel>], iteration_bounds = array<i64: 2>, scalar_prefetch = 0 : i64, scratch_operands = 0 : i64, tpu.core_type = #tpu.core_type<tc>, window_params = [{transform_indices = @transform_0, window_bounds = array<i64: 1, 8, 8, 128>}, {pipeline_mode = #tpu.pipeline_mode<synchronous>, transform_indices = @transform_1, window_bounds = array<i64: 1, 128>}, {pipeline_mode = #tpu.pipeline_mode<synchronous>, transform_indices = @transform_2, window_bounds = array<i64: 1, 128>}, {transform_indices = @transform_3, window_bounds = array<i64: 1, 8, 8, 128>}]} {
    %c0 = arith.constant 0 : index
    %c0_0 = arith.constant 0 : index
    %c0_1 = arith.constant 0 : index
    %c0_2 = arith.constant 0 : index
    %0 = vector.load %arg1[%c0, %c0_0, %c0_1, %c0_2] : memref<1x8x8x128xbf16, #tpu.memory_space<vmem>>, vector<1x8x8x128xbf16>
    %1 = arith.extf %0 : vector<1x8x8x128xbf16> to vector<1x8x8x128xf32>
    %c0_3 = arith.constant 0 : index
    %c0_4 = arith.constant 0 : index
    %2 = vector.load %arg2[%c0_3, %c0_4] : memref<1x128xf32, #tpu.memory_space<vmem>>, vector<1x128xf32>
    %3 = vector.shape_cast %2 : vector<1x128xf32> to vector<1x1x1x128xf32>
    %4 = vector.broadcast %3 : vector<1x1x1x128xf32> to vector<1x8x8x128xf32>
    %5 = arith.mulf %1, %4 : vector<1x8x8x128xf32>
    %c0_5 = arith.constant 0 : index
    %c0_6 = arith.constant 0 : index
    %6 = vector.load %arg3[%c0_5, %c0_6] : memref<1x128xf32, #tpu.memory_space<vmem>>, vector<1x128xf32>
    %7 = vector.shape_cast %6 : vector<1x128xf32> to vector<1x1x1x128xf32>
    %8 = vector.broadcast %7 : vector<1x1x1x128xf32> to vector<1x8x8x128xf32>
    %9 = arith.addf %5, %8 : vector<1x8x8x128xf32>
    %cst = arith.constant 0.000000e+00 : f32
    %10 = vector.broadcast %cst : f32 to vector<1x8x8x128xf32>
    %11 = arith.cmpf ogt, %9, %10 : vector<1x8x8x128xf32>
    %cst_7 = arith.constant 2.000000e-01 : f32
    %12 = vector.broadcast %cst_7 : f32 to vector<1x8x8x128xf32>
    %13 = arith.mulf %12, %9 : vector<1x8x8x128xf32>
    %14 = arith.select %11, %9, %13 : vector<1x8x8x128xi1>, vector<1x8x8x128xf32>
    %15 = arith.truncf %14 : vector<1x8x8x128xf32> to vector<1x8x8x128xbf16>
    %c0_8 = arith.constant 0 : index
    %c0_9 = arith.constant 0 : index
    %c0_10 = arith.constant 0 : index
    %c0_11 = arith.constant 0 : index
    %16 = vector.load %arg4[%c0_8, %c0_9, %c0_10, %c0_11] : memref<1x8x8x128xbf16, #tpu.memory_space<vmem>>, vector<1x8x8x128xbf16>
    tpu.vector_store %arg4[%c0_8, %c0_9, %c0_10, %c0_11], %15 {strides = array<i32>} : memref<1x8x8x128xbf16, #tpu.memory_space<vmem>>, vector<1x8x8x128xbf16>,
    return
  }
  func.func @transform_0(%arg0: i32) -> (i32, i32, i32, i32) {
    %c0_i32 = arith.constant 0 : i32
    %c0_i32_0 = arith.constant 0 : i32
    %c0_i32_1 = arith.constant 0 : i32
    %c0_i32_2 = arith.constant 0 : i32
    return %arg0, %c0_i32, %c0_i32_0, %c0_i32_1 : i32, i32, i32, i32
  }
  func.func @transform_1(%arg0: i32) -> (i32, i32) {
    %c0_i32 = arith.constant 0 : i32
    %c0_i32_0 = arith.constant 0 : i32
    %c0_i32_1 = arith.constant 0 : i32
    return %c0_i32, %c0_i32_0 : i32, i32
  }
  func.func @transform_2(%arg0: i32) -> (i32, i32) {
    %c0_i32 = arith.constant 0 : i32
    %c0_i32_0 = arith.constant 0 : i32
    %c0_i32_1 = arith.constant 0 : i32
    return %c0_i32, %c0_i32_0 : i32, i32
  }
  func.func @transform_3(%arg0: i32) -> (i32, i32, i32, i32) {
    %c0_i32 = arith.constant 0 : i32
    %c0_i32_0 = arith.constant 0 : i32
    %c0_i32_1 = arith.constant 0 : i32
    %c0_i32_2 = arith.constant 0 : i32
    return %arg0, %c0_i32, %c0_i32_0, %c0_i32_1 : i32, i32, i32, i32
  }
}

module attributes {stable_mosaic.version = 11 : i64} {
  func.func @_conv_taps_stats_kernel(%arg0: i32, %arg1: memref<1x10x4x64xbf16, #tpu.memory_space<vmem>>, %arg2: memref<4x64x128xbf16, #tpu.memory_space<vmem>>, %arg3: memref<1x4x4x128xbf16, #tpu.memory_space<vmem>>, %arg4: memref<1x1x128xf32, #tpu.memory_space<vmem>>, %arg5: memref<1x1x128xf32, #tpu.memory_space<vmem>>) attributes {dimension_semantics = [#tpu.dimension_semantics<parallel>], iteration_bounds = array<i64: 2>, scalar_prefetch = 0 : i64, scratch_operands = 0 : i64, tpu.core_type = #tpu.core_type<tc>, window_params = [{transform_indices = @transform_0, window_bounds = array<i64: 1, 10, 4, 64>}, {pipeline_mode = #tpu.pipeline_mode<synchronous>, transform_indices = @transform_1, window_bounds = array<i64: 4, 64, 128>}, {transform_indices = @transform_2, window_bounds = array<i64: 1, 4, 4, 128>}, {transform_indices = @transform_3, window_bounds = array<i64: 1, 1, 128>}, {transform_indices = @transform_4, window_bounds = array<i64: 1, 1, 128>}]} {
    %cst = arith.constant 0.000000e+00 : f32
    %0 = vector.broadcast %cst : f32 to vector<1x128xf32>
    %cst_0 = arith.constant 0.000000e+00 : f32
    %1 = vector.broadcast %cst_0 : f32 to vector<1x128xf32>
    %c0_i32 = arith.constant 0 : i32
    %c4_i32 = arith.constant 4 : i32
    %2 = arith.addi %c0_i32, %c4_i32 : i32
    %c1_i32 = arith.constant 1 : i32
    %3:2 = scf.for %arg6 = %c0_i32 to %2 step %c1_i32 iter_args(%arg7 = %0, %arg8 = %1) -> (vector<1x128xf32>, vector<1x128xf32>)  : i32 {
      %cst_7 = arith.constant 0.000000e+00 : f32
      %8 = vector.broadcast %cst_7 : f32 to vector<4x128xf32>
      %c0_i32_8 = arith.constant 0 : i32
      %9 = arith.addi %c0_i32_8, %arg6 : i32
      %c0_i32_9 = arith.constant 0 : i32
      %10 = arith.addi %9, %c0_i32_9 : i32
      %c0_10 = arith.constant 0 : index
      %11 = arith.index_cast %10 : i32 to index
      %c0_11 = arith.constant 0 : index
      %c0_12 = arith.constant 0 : index
      %12 = vector.load %arg1[%c0_10, %11, %c0_11, %c0_12] : memref<1x10x4x64xbf16, #tpu.memory_space<vmem>>, vector<1x1x4x64xbf16>
      %13 = vector.shape_cast %12 : vector<1x1x4x64xbf16> to vector<4x64xbf16>
      %c0_13 = arith.constant 0 : index
      %c0_14 = arith.constant 0 : index
      %c0_15 = arith.constant 0 : index
      %14 = vector.load %arg2[%c0_13, %c0_14, %c0_15] : memref<4x64x128xbf16, #tpu.memory_space<vmem>>, vector<1x64x128xbf16>
      %15 = vector.shape_cast %14 : vector<1x64x128xbf16> to vector<64x128xbf16>
      %cst_16 = arith.constant dense<0.000000e+00> : vector<4x128xf32>
      %16 = tpu.matmul %13, %15, %cst_16 {dimension_numbers = #tpu.dot_dimension_numbers<[1], [0], [0], [1], [0, 0, 1, 1], [], []>} : vector<4x64xbf16>, vector<64x128xbf16>, vector<4x128xf32> -> vector<4x128xf32>
      %17 = arith.addf %8, %16 : vector<4x128xf32>
      %c5_i32 = arith.constant 5 : i32
      %18 = arith.addi %c5_i32, %arg6 : i32
      %c0_i32_17 = arith.constant 0 : i32
      %19 = arith.addi %18, %c0_i32_17 : i32
      %c0_18 = arith.constant 0 : index
      %20 = arith.index_cast %19 : i32 to index
      %c0_19 = arith.constant 0 : index
      %c0_20 = arith.constant 0 : index
      %21 = vector.load %arg1[%c0_18, %20, %c0_19, %c0_20] : memref<1x10x4x64xbf16, #tpu.memory_space<vmem>>, vector<1x1x4x64xbf16>
      %22 = vector.shape_cast %21 : vector<1x1x4x64xbf16> to vector<4x64xbf16>
      %c1 = arith.constant 1 : index
      %c0_21 = arith.constant 0 : index
      %c0_22 = arith.constant 0 : index
      %23 = vector.load %arg2[%c1, %c0_21, %c0_22] : memref<4x64x128xbf16, #tpu.memory_space<vmem>>, vector<1x64x128xbf16>
      %24 = vector.shape_cast %23 : vector<1x64x128xbf16> to vector<64x128xbf16>
      %cst_23 = arith.constant dense<0.000000e+00> : vector<4x128xf32>
      %25 = tpu.matmul %22, %24, %cst_23 {dimension_numbers = #tpu.dot_dimension_numbers<[1], [0], [0], [1], [0, 0, 1, 1], [], []>} : vector<4x64xbf16>, vector<64x128xbf16>, vector<4x128xf32> -> vector<4x128xf32>
      %26 = arith.addf %17, %25 : vector<4x128xf32>
      %c0_i32_24 = arith.constant 0 : i32
      %27 = arith.addi %c0_i32_24, %arg6 : i32
      %c1_i32_25 = arith.constant 1 : i32
      %28 = arith.addi %27, %c1_i32_25 : i32
      %c0_26 = arith.constant 0 : index
      %29 = arith.index_cast %28 : i32 to index
      %c0_27 = arith.constant 0 : index
      %c0_28 = arith.constant 0 : index
      %30 = vector.load %arg1[%c0_26, %29, %c0_27, %c0_28] : memref<1x10x4x64xbf16, #tpu.memory_space<vmem>>, vector<1x1x4x64xbf16>
      %31 = vector.shape_cast %30 : vector<1x1x4x64xbf16> to vector<4x64xbf16>
      %c2 = arith.constant 2 : index
      %c0_29 = arith.constant 0 : index
      %c0_30 = arith.constant 0 : index
      %32 = vector.load %arg2[%c2, %c0_29, %c0_30] : memref<4x64x128xbf16, #tpu.memory_space<vmem>>, vector<1x64x128xbf16>
      %33 = vector.shape_cast %32 : vector<1x64x128xbf16> to vector<64x128xbf16>
      %cst_31 = arith.constant dense<0.000000e+00> : vector<4x128xf32>
      %34 = tpu.matmul %31, %33, %cst_31 {dimension_numbers = #tpu.dot_dimension_numbers<[1], [0], [0], [1], [0, 0, 1, 1], [], []>} : vector<4x64xbf16>, vector<64x128xbf16>, vector<4x128xf32> -> vector<4x128xf32>
      %35 = arith.addf %26, %34 : vector<4x128xf32>
      %c5_i32_32 = arith.constant 5 : i32
      %36 = arith.addi %c5_i32_32, %arg6 : i32
      %c1_i32_33 = arith.constant 1 : i32
      %37 = arith.addi %36, %c1_i32_33 : i32
      %c0_34 = arith.constant 0 : index
      %38 = arith.index_cast %37 : i32 to index
      %c0_35 = arith.constant 0 : index
      %c0_36 = arith.constant 0 : index
      %39 = vector.load %arg1[%c0_34, %38, %c0_35, %c0_36] : memref<1x10x4x64xbf16, #tpu.memory_space<vmem>>, vector<1x1x4x64xbf16>
      %40 = vector.shape_cast %39 : vector<1x1x4x64xbf16> to vector<4x64xbf16>
      %c3 = arith.constant 3 : index
      %c0_37 = arith.constant 0 : index
      %c0_38 = arith.constant 0 : index
      %41 = vector.load %arg2[%c3, %c0_37, %c0_38] : memref<4x64x128xbf16, #tpu.memory_space<vmem>>, vector<1x64x128xbf16>
      %42 = vector.shape_cast %41 : vector<1x64x128xbf16> to vector<64x128xbf16>
      %cst_39 = arith.constant dense<0.000000e+00> : vector<4x128xf32>
      %43 = tpu.matmul %40, %42, %cst_39 {dimension_numbers = #tpu.dot_dimension_numbers<[1], [0], [0], [1], [0, 0, 1, 1], [], []>} : vector<4x64xbf16>, vector<64x128xbf16>, vector<4x128xf32> -> vector<4x128xf32>
      %44 = arith.addf %35, %43 : vector<4x128xf32>
      %45 = arith.truncf %44 : vector<4x128xf32> to vector<4x128xbf16>
      %c0_40 = arith.constant 0 : index
      %46 = arith.index_cast %arg6 : i32 to index
      %c0_41 = arith.constant 0 : index
      %c0_42 = arith.constant 0 : index
      %47 = vector.load %arg3[%c0_40, %46, %c0_41, %c0_42] : memref<1x4x4x128xbf16, #tpu.memory_space<vmem>>, vector<1x1x4x128xbf16>
      %48 = vector.shape_cast %47 : vector<1x1x4x128xbf16> to vector<4x128xbf16>
      %49 = vector.shape_cast %45 : vector<4x128xbf16> to vector<1x1x4x128xbf16>
      tpu.vector_store %arg3[%c0_40, %46, %c0_41, %c0_42], %49 {strides = array<i32>} : memref<1x4x4x128xbf16, #tpu.memory_space<vmem>>, vector<1x1x4x128xbf16>,
      %cst_43 = arith.constant dense<0.000000e+00> : vector<128xf32>
      %50 = vector.multi_reduction <add>, %44, %cst_43 [0] : vector<4x128xf32> to vector<128xf32>
      %51 = vector.shape_cast %50 : vector<128xf32> to vector<1x128xf32>
      %52 = arith.addf %arg7, %51 : vector<1x128xf32>
      %53 = arith.mulf %44, %44 : vector<4x128xf32>
      %cst_44 = arith.constant dense<0.000000e+00> : vector<128xf32>
      %54 = vector.multi_reduction <add>, %53, %cst_44 [0] : vector<4x128xf32> to vector<128xf32>
      %55 = vector.shape_cast %54 : vector<128xf32> to vector<1x128xf32>
      %56 = arith.addf %arg8, %55 : vector<1x128xf32>
      scf.yield %52, %56 : vector<1x128xf32>, vector<1x128xf32>
    }
    %c4_i32_1 = arith.constant 4 : i32
    %4 = vector.shape_cast %3#0 : vector<1x128xf32> to vector<1x1x128xf32>
    %c0 = arith.constant 0 : index
    %c0_2 = arith.constant 0 : index
    %c0_3 = arith.constant 0 : index
    %5 = vector.load %arg4[%c0, %c0_2, %c0_3] : memref<1x1x128xf32, #tpu.memory_space<vmem>>, vector<1x1x128xf32>
    tpu.vector_store %arg4[%c0, %c0_2, %c0_3], %4 {strides = array<i32>} : memref<1x1x128xf32, #tpu.memory_space<vmem>>, vector<1x1x128xf32>,
    %6 = vector.shape_cast %3#1 : vector<1x128xf32> to vector<1x1x128xf32>
    %c0_4 = arith.constant 0 : index
    %c0_5 = arith.constant 0 : index
    %c0_6 = arith.constant 0 : index
    %7 = vector.load %arg5[%c0_4, %c0_5, %c0_6] : memref<1x1x128xf32, #tpu.memory_space<vmem>>, vector<1x1x128xf32>
    tpu.vector_store %arg5[%c0_4, %c0_5, %c0_6], %6 {strides = array<i32>} : memref<1x1x128xf32, #tpu.memory_space<vmem>>, vector<1x1x128xf32>,
    return
  }
  func.func @transform_0(%arg0: i32) -> (i32, i32, i32, i32) {
    %c0_i32 = arith.constant 0 : i32
    %c0_i32_0 = arith.constant 0 : i32
    %c0_i32_1 = arith.constant 0 : i32
    %c0_i32_2 = arith.constant 0 : i32
    return %arg0, %c0_i32, %c0_i32_0, %c0_i32_1 : i32, i32, i32, i32
  }
  func.func @transform_1(%arg0: i32) -> (i32, i32, i32) {
    %c0_i32 = arith.constant 0 : i32
    %c0_i32_0 = arith.constant 0 : i32
    %c0_i32_1 = arith.constant 0 : i32
    %c0_i32_2 = arith.constant 0 : i32
    return %c0_i32, %c0_i32_0, %c0_i32_1 : i32, i32, i32
  }
  func.func @transform_2(%arg0: i32) -> (i32, i32, i32, i32) {
    %c0_i32 = arith.constant 0 : i32
    %c0_i32_0 = arith.constant 0 : i32
    %c0_i32_1 = arith.constant 0 : i32
    %c0_i32_2 = arith.constant 0 : i32
    return %arg0, %c0_i32, %c0_i32_0, %c0_i32_1 : i32, i32, i32, i32
  }
  func.func @transform_3(%arg0: i32) -> (i32, i32, i32) {
    %c0_i32 = arith.constant 0 : i32
    %c0_i32_0 = arith.constant 0 : i32
    %c0_i32_1 = arith.constant 0 : i32
    return %arg0, %c0_i32, %c0_i32_0 : i32, i32, i32
  }
  func.func @transform_4(%arg0: i32) -> (i32, i32, i32) {
    %c0_i32 = arith.constant 0 : i32
    %c0_i32_0 = arith.constant 0 : i32
    %c0_i32_1 = arith.constant 0 : i32
    return %arg0, %c0_i32, %c0_i32_0 : i32, i32, i32
  }
}

module attributes {stable_mosaic.version = 11 : i64} {
  func.func @_bn_lrelu_kernel(%arg0: i32, %arg1: memref<1x4x4x128xbf16, #tpu.memory_space<vmem>>, %arg2: memref<1x128xf32, #tpu.memory_space<vmem>>, %arg3: memref<1x128xf32, #tpu.memory_space<vmem>>, %arg4: memref<1x4x4x128xbf16, #tpu.memory_space<vmem>>) attributes {dimension_semantics = [#tpu.dimension_semantics<parallel>], iteration_bounds = array<i64: 2>, scalar_prefetch = 0 : i64, scratch_operands = 0 : i64, tpu.core_type = #tpu.core_type<tc>, window_params = [{transform_indices = @transform_0, window_bounds = array<i64: 1, 4, 4, 128>}, {pipeline_mode = #tpu.pipeline_mode<synchronous>, transform_indices = @transform_1, window_bounds = array<i64: 1, 128>}, {pipeline_mode = #tpu.pipeline_mode<synchronous>, transform_indices = @transform_2, window_bounds = array<i64: 1, 128>}, {transform_indices = @transform_3, window_bounds = array<i64: 1, 4, 4, 128>}]} {
    %c0 = arith.constant 0 : index
    %c0_0 = arith.constant 0 : index
    %c0_1 = arith.constant 0 : index
    %c0_2 = arith.constant 0 : index
    %0 = vector.load %arg1[%c0, %c0_0, %c0_1, %c0_2] : memref<1x4x4x128xbf16, #tpu.memory_space<vmem>>, vector<1x4x4x128xbf16>
    %1 = arith.extf %0 : vector<1x4x4x128xbf16> to vector<1x4x4x128xf32>
    %c0_3 = arith.constant 0 : index
    %c0_4 = arith.constant 0 : index
    %2 = vector.load %arg2[%c0_3, %c0_4] : memref<1x128xf32, #tpu.memory_space<vmem>>, vector<1x128xf32>
    %3 = vector.shape_cast %2 : vector<1x128xf32> to vector<1x1x1x128xf32>
    %4 = vector.broadcast %3 : vector<1x1x1x128xf32> to vector<1x4x4x128xf32>
    %5 = arith.mulf %1, %4 : vector<1x4x4x128xf32>
    %c0_5 = arith.constant 0 : index
    %c0_6 = arith.constant 0 : index
    %6 = vector.load %arg3[%c0_5, %c0_6] : memref<1x128xf32, #tpu.memory_space<vmem>>, vector<1x128xf32>
    %7 = vector.shape_cast %6 : vector<1x128xf32> to vector<1x1x1x128xf32>
    %8 = vector.broadcast %7 : vector<1x1x1x128xf32> to vector<1x4x4x128xf32>
    %9 = arith.addf %5, %8 : vector<1x4x4x128xf32>
    %cst = arith.constant 0.000000e+00 : f32
    %10 = vector.broadcast %cst : f32 to vector<1x4x4x128xf32>
    %11 = arith.cmpf ogt, %9, %10 : vector<1x4x4x128xf32>
    %cst_7 = arith.constant 2.000000e-01 : f32
    %12 = vector.broadcast %cst_7 : f32 to vector<1x4x4x128xf32>
    %13 = arith.mulf %12, %9 : vector<1x4x4x128xf32>
    %14 = arith.select %11, %9, %13 : vector<1x4x4x128xi1>, vector<1x4x4x128xf32>
    %15 = arith.truncf %14 : vector<1x4x4x128xf32> to vector<1x4x4x128xbf16>
    %c0_8 = arith.constant 0 : index
    %c0_9 = arith.constant 0 : index
    %c0_10 = arith.constant 0 : index
    %c0_11 = arith.constant 0 : index
    %16 = vector.load %arg4[%c0_8, %c0_9, %c0_10, %c0_11] : memref<1x4x4x128xbf16, #tpu.memory_space<vmem>>, vector<1x4x4x128xbf16>
    tpu.vector_store %arg4[%c0_8, %c0_9, %c0_10, %c0_11], %15 {strides = array<i32>} : memref<1x4x4x128xbf16, #tpu.memory_space<vmem>>, vector<1x4x4x128xbf16>,
    return
  }
  func.func @transform_0(%arg0: i32) -> (i32, i32, i32, i32) {
    %c0_i32 = arith.constant 0 : i32
    %c0_i32_0 = arith.constant 0 : i32
    %c0_i32_1 = arith.constant 0 : i32
    %c0_i32_2 = arith.constant 0 : i32
    return %arg0, %c0_i32, %c0_i32_0, %c0_i32_1 : i32, i32, i32, i32
  }
  func.func @transform_1(%arg0: i32) -> (i32, i32) {
    %c0_i32 = arith.constant 0 : i32
    %c0_i32_0 = arith.constant 0 : i32
    %c0_i32_1 = arith.constant 0 : i32
    return %c0_i32, %c0_i32_0 : i32, i32
  }
  func.func @transform_2(%arg0: i32) -> (i32, i32) {
    %c0_i32 = arith.constant 0 : i32
    %c0_i32_0 = arith.constant 0 : i32
    %c0_i32_1 = arith.constant 0 : i32
    return %c0_i32, %c0_i32_0 : i32, i32
  }
  func.func @transform_3(%arg0: i32) -> (i32, i32, i32, i32) {
    %c0_i32 = arith.constant 0 : i32
    %c0_i32_0 = arith.constant 0 : i32
    %c0_i32_1 = arith.constant 0 : i32
    %c0_i32_2 = arith.constant 0 : i32
    return %arg0, %c0_i32, %c0_i32_0, %c0_i32_1 : i32, i32, i32, i32
  }
}

module attributes {stable_mosaic.version = 11 : i64} {
  func.func @_bn_lrelu_kernel(%arg0: i32, %arg1: memref<1x2x2x128xbf16, #tpu.memory_space<vmem>>, %arg2: memref<1x128xf32, #tpu.memory_space<vmem>>, %arg3: memref<1x128xf32, #tpu.memory_space<vmem>>, %arg4: memref<1x2x2x128xf32, #tpu.memory_space<vmem>>) attributes {dimension_semantics = [#tpu.dimension_semantics<parallel>], iteration_bounds = array<i64: 2>, scalar_prefetch = 0 : i64, scratch_operands = 0 : i64, tpu.core_type = #tpu.core_type<tc>, window_params = [{transform_indices = @transform_0, window_bounds = array<i64: 1, 2, 2, 128>}, {pipeline_mode = #tpu.pipeline_mode<synchronous>, transform_indices = @transform_1, window_bounds = array<i64: 1, 128>}, {pipeline_mode = #tpu.pipeline_mode<synchronous>, transform_indices = @transform_2, window_bounds = array<i64: 1, 128>}, {transform_indices = @transform_3, window_bounds = array<i64: 1, 2, 2, 128>}]} {
    %c0 = arith.constant 0 : index
    %c0_0 = arith.constant 0 : index
    %c0_1 = arith.constant 0 : index
    %c0_2 = arith.constant 0 : index
    %0 = vector.load %arg1[%c0, %c0_0, %c0_1, %c0_2] : memref<1x2x2x128xbf16, #tpu.memory_space<vmem>>, vector<1x2x2x128xbf16>
    %1 = arith.extf %0 : vector<1x2x2x128xbf16> to vector<1x2x2x128xf32>
    %c0_3 = arith.constant 0 : index
    %c0_4 = arith.constant 0 : index
    %2 = vector.load %arg2[%c0_3, %c0_4] : memref<1x128xf32, #tpu.memory_space<vmem>>, vector<1x128xf32>
    %3 = vector.shape_cast %2 : vector<1x128xf32> to vector<1x1x1x128xf32>
    %4 = vector.broadcast %3 : vector<1x1x1x128xf32> to vector<1x2x2x128xf32>
    %5 = arith.mulf %1, %4 : vector<1x2x2x128xf32>
    %c0_5 = arith.constant 0 : index
    %c0_6 = arith.constant 0 : index
    %6 = vector.load %arg3[%c0_5, %c0_6] : memref<1x128xf32, #tpu.memory_space<vmem>>, vector<1x128xf32>
    %7 = vector.shape_cast %6 : vector<1x128xf32> to vector<1x1x1x128xf32>
    %8 = vector.broadcast %7 : vector<1x1x1x128xf32> to vector<1x2x2x128xf32>
    %9 = arith.addf %5, %8 : vector<1x2x2x128xf32>
    %cst = arith.constant 0.000000e+00 : f32
    %10 = vector.broadcast %cst : f32 to vector<1x2x2x128xf32>
    %11 = arith.cmpf ogt, %9, %10 : vector<1x2x2x128xf32>
    %cst_7 = arith.constant 2.000000e-01 : f32
    %12 = vector.broadcast %cst_7 : f32 to vector<1x2x2x128xf32>
    %13 = arith.mulf %12, %9 : vector<1x2x2x128xf32>
    %14 = arith.select %11, %9, %13 : vector<1x2x2x128xi1>, vector<1x2x2x128xf32>
    %c0_8 = arith.constant 0 : index
    %c0_9 = arith.constant 0 : index
    %c0_10 = arith.constant 0 : index
    %c0_11 = arith.constant 0 : index
    %15 = vector.load %arg4[%c0_8, %c0_9, %c0_10, %c0_11] : memref<1x2x2x128xf32, #tpu.memory_space<vmem>>, vector<1x2x2x128xf32>
    tpu.vector_store %arg4[%c0_8, %c0_9, %c0_10, %c0_11], %14 {strides = array<i32>} : memref<1x2x2x128xf32, #tpu.memory_space<vmem>>, vector<1x2x2x128xf32>,
    return
  }
  func.func @transform_0(%arg0: i32) -> (i32, i32, i32, i32) {
    %c0_i32 = arith.constant 0 : i32
    %c0_i32_0 = arith.constant 0 : i32
    %c0_i32_1 = arith.constant 0 : i32
    %c0_i32_2 = arith.constant 0 : i32
    return %arg0, %c0_i32, %c0_i32_0, %c0_i32_1 : i32, i32, i32, i32
  }
  func.func @transform_1(%arg0: i32) -> (i32, i32) {
    %c0_i32 = arith.constant 0 : i32
    %c0_i32_0 = arith.constant 0 : i32
    %c0_i32_1 = arith.constant 0 : i32
    return %c0_i32, %c0_i32_0 : i32, i32
  }
  func.func @transform_2(%arg0: i32) -> (i32, i32) {
    %c0_i32 = arith.constant 0 : i32
    %c0_i32_0 = arith.constant 0 : i32
    %c0_i32_1 = arith.constant 0 : i32
    return %c0_i32, %c0_i32_0 : i32, i32
  }
  func.func @transform_3(%arg0: i32) -> (i32, i32, i32, i32) {
    %c0_i32 = arith.constant 0 : i32
    %c0_i32_0 = arith.constant 0 : i32
    %c0_i32_1 = arith.constant 0 : i32
    %c0_i32_2 = arith.constant 0 : i32
    return %arg0, %c0_i32, %c0_i32_0, %c0_i32_1 : i32, i32, i32, i32
  }
}

module attributes {stable_mosaic.version = 11 : i64} {
  func.func @_conv_taps_stats_kernel(%arg0: i32, %arg1: memref<1x6x2x128xbf16, #tpu.memory_space<vmem>>, %arg2: memref<4x128x128xbf16, #tpu.memory_space<vmem>>, %arg3: memref<1x2x2x128xbf16, #tpu.memory_space<vmem>>, %arg4: memref<1x1x128xf32, #tpu.memory_space<vmem>>, %arg5: memref<1x1x128xf32, #tpu.memory_space<vmem>>) attributes {dimension_semantics = [#tpu.dimension_semantics<parallel>], iteration_bounds = array<i64: 2>, scalar_prefetch = 0 : i64, scratch_operands = 0 : i64, tpu.core_type = #tpu.core_type<tc>, window_params = [{transform_indices = @transform_0, window_bounds = array<i64: 1, 6, 2, 128>}, {pipeline_mode = #tpu.pipeline_mode<synchronous>, transform_indices = @transform_1, window_bounds = array<i64: 4, 128, 128>}, {transform_indices = @transform_2, window_bounds = array<i64: 1, 2, 2, 128>}, {transform_indices = @transform_3, window_bounds = array<i64: 1, 1, 128>}, {transform_indices = @transform_4, window_bounds = array<i64: 1, 1, 128>}]} {
    %cst = arith.constant 0.000000e+00 : f32
    %0 = vector.broadcast %cst : f32 to vector<1x128xf32>
    %cst_0 = arith.constant 0.000000e+00 : f32
    %1 = vector.broadcast %cst_0 : f32 to vector<1x128xf32>
    %c0_i32 = arith.constant 0 : i32
    %c2_i32 = arith.constant 2 : i32
    %2 = arith.addi %c0_i32, %c2_i32 : i32
    %c1_i32 = arith.constant 1 : i32
    %3:2 = scf.for %arg6 = %c0_i32 to %2 step %c1_i32 iter_args(%arg7 = %0, %arg8 = %1) -> (vector<1x128xf32>, vector<1x128xf32>)  : i32 {
      %cst_7 = arith.constant 0.000000e+00 : f32
      %8 = vector.broadcast %cst_7 : f32 to vector<2x128xf32>
      %c0_i32_8 = arith.constant 0 : i32
      %9 = arith.addi %c0_i32_8, %arg6 : i32
      %c0_i32_9 = arith.constant 0 : i32
      %10 = arith.addi %9, %c0_i32_9 : i32
      %c0_10 = arith.constant 0 : index
      %11 = arith.index_cast %10 : i32 to index
      %c0_11 = arith.constant 0 : index
      %c0_12 = arith.constant 0 : index
      %12 = vector.load %arg1[%c0_10, %11, %c0_11, %c0_12] : memref<1x6x2x128xbf16, #tpu.memory_space<vmem>>, vector<1x1x2x128xbf16>
      %13 = vector.shape_cast %12 : vector<1x1x2x128xbf16> to vector<2x128xbf16>
      %c0_13 = arith.constant 0 : index
      %c0_14 = arith.constant 0 : index
      %c0_15 = arith.constant 0 : index
      %14 = vector.load %arg2[%c0_13, %c0_14, %c0_15] : memref<4x128x128xbf16, #tpu.memory_space<vmem>>, vector<1x128x128xbf16>
      %15 = vector.shape_cast %14 : vector<1x128x128xbf16> to vector<128x128xbf16>
      %cst_16 = arith.constant dense<0.000000e+00> : vector<2x128xf32>
      %16 = tpu.matmul %13, %15, %cst_16 {dimension_numbers = #tpu.dot_dimension_numbers<[1], [0], [0], [1], [0, 0, 1, 1], [], []>} : vector<2x128xbf16>, vector<128x128xbf16>, vector<2x128xf32> -> vector<2x128xf32>
      %17 = arith.addf %8, %16 : vector<2x128xf32>
      %c3_i32 = arith.constant 3 : i32
      %18 = arith.addi %c3_i32, %arg6 : i32
      %c0_i32_17 = arith.constant 0 : i32
      %19 = arith.addi %18, %c0_i32_17 : i32
      %c0_18 = arith.constant 0 : index
      %20 = arith.index_cast %19 : i32 to index
      %c0_19 = arith.constant 0 : index
      %c0_20 = arith.constant 0 : index
      %21 = vector.load %arg1[%c0_18, %20, %c0_19, %c0_20] : memref<1x6x2x128xbf16, #tpu.memory_space<vmem>>, vector<1x1x2x128xbf16>
      %22 = vector.shape_cast %21 : vector<1x1x2x128xbf16> to vector<2x128xbf16>
      %c1 = arith.constant 1 : index
      %c0_21 = arith.constant 0 : index
      %c0_22 = arith.constant 0 : index
      %23 = vector.load %arg2[%c1, %c0_21, %c0_22] : memref<4x128x128xbf16, #tpu.memory_space<vmem>>, vector<1x128x128xbf16>
      %24 = vector.shape_cast %23 : vector<1x128x128xbf16> to vector<128x128xbf16>
      %cst_23 = arith.constant dense<0.000000e+00> : vector<2x128xf32>
      %25 = tpu.matmul %22, %24, %cst_23 {dimension_numbers = #tpu.dot_dimension_numbers<[1], [0], [0], [1], [0, 0, 1, 1], [], []>} : vector<2x128xbf16>, vector<128x128xbf16>, vector<2x128xf32> -> vector<2x128xf32>
      %26 = arith.addf %17, %25 : vector<2x128xf32>
      %c0_i32_24 = arith.constant 0 : i32
      %27 = arith.addi %c0_i32_24, %arg6 : i32
      %c1_i32_25 = arith.constant 1 : i32
      %28 = arith.addi %27, %c1_i32_25 : i32
      %c0_26 = arith.constant 0 : index
      %29 = arith.index_cast %28 : i32 to index
      %c0_27 = arith.constant 0 : index
      %c0_28 = arith.constant 0 : index
      %30 = vector.load %arg1[%c0_26, %29, %c0_27, %c0_28] : memref<1x6x2x128xbf16, #tpu.memory_space<vmem>>, vector<1x1x2x128xbf16>
      %31 = vector.shape_cast %30 : vector<1x1x2x128xbf16> to vector<2x128xbf16>
      %c2 = arith.constant 2 : index
      %c0_29 = arith.constant 0 : index
      %c0_30 = arith.constant 0 : index
      %32 = vector.load %arg2[%c2, %c0_29, %c0_30] : memref<4x128x128xbf16, #tpu.memory_space<vmem>>, vector<1x128x128xbf16>
      %33 = vector.shape_cast %32 : vector<1x128x128xbf16> to vector<128x128xbf16>
      %cst_31 = arith.constant dense<0.000000e+00> : vector<2x128xf32>
      %34 = tpu.matmul %31, %33, %cst_31 {dimension_numbers = #tpu.dot_dimension_numbers<[1], [0], [0], [1], [0, 0, 1, 1], [], []>} : vector<2x128xbf16>, vector<128x128xbf16>, vector<2x128xf32> -> vector<2x128xf32>
      %35 = arith.addf %26, %34 : vector<2x128xf32>
      %c3_i32_32 = arith.constant 3 : i32
      %36 = arith.addi %c3_i32_32, %arg6 : i32
      %c1_i32_33 = arith.constant 1 : i32
      %37 = arith.addi %36, %c1_i32_33 : i32
      %c0_34 = arith.constant 0 : index
      %38 = arith.index_cast %37 : i32 to index
      %c0_35 = arith.constant 0 : index
      %c0_36 = arith.constant 0 : index
      %39 = vector.load %arg1[%c0_34, %38, %c0_35, %c0_36] : memref<1x6x2x128xbf16, #tpu.memory_space<vmem>>, vector<1x1x2x128xbf16>
      %40 = vector.shape_cast %39 : vector<1x1x2x128xbf16> to vector<2x128xbf16>
      %c3 = arith.constant 3 : index
      %c0_37 = arith.constant 0 : index
      %c0_38 = arith.constant 0 : index
      %41 = vector.load %arg2[%c3, %c0_37, %c0_38] : memref<4x128x128xbf16, #tpu.memory_space<vmem>>, vector<1x128x128xbf16>
      %42 = vector.shape_cast %41 : vector<1x128x128xbf16> to vector<128x128xbf16>
      %cst_39 = arith.constant dense<0.000000e+00> : vector<2x128xf32>
      %43 = tpu.matmul %40, %42, %cst_39 {dimension_numbers = #tpu.dot_dimension_numbers<[1], [0], [0], [1], [0, 0, 1, 1], [], []>} : vector<2x128xbf16>, vector<128x128xbf16>, vector<2x128xf32> -> vector<2x128xf32>
      %44 = arith.addf %35, %43 : vector<2x128xf32>
      %45 = arith.truncf %44 : vector<2x128xf32> to vector<2x128xbf16>
      %c0_40 = arith.constant 0 : index
      %46 = arith.index_cast %arg6 : i32 to index
      %c0_41 = arith.constant 0 : index
      %c0_42 = arith.constant 0 : index
      %47 = vector.load %arg3[%c0_40, %46, %c0_41, %c0_42] : memref<1x2x2x128xbf16, #tpu.memory_space<vmem>>, vector<1x1x2x128xbf16>
      %48 = vector.shape_cast %47 : vector<1x1x2x128xbf16> to vector<2x128xbf16>
      %49 = vector.shape_cast %45 : vector<2x128xbf16> to vector<1x1x2x128xbf16>
      tpu.vector_store %arg3[%c0_40, %46, %c0_41, %c0_42], %49 {strides = array<i32>} : memref<1x2x2x128xbf16, #tpu.memory_space<vmem>>, vector<1x1x2x128xbf16>,
      %cst_43 = arith.constant dense<0.000000e+00> : vector<128xf32>
      %50 = vector.multi_reduction <add>, %44, %cst_43 [0] : vector<2x128xf32> to vector<128xf32>
      %51 = vector.shape_cast %50 : vector<128xf32> to vector<1x128xf32>
      %52 = arith.addf %arg7, %51 : vector<1x128xf32>
      %53 = arith.mulf %44, %44 : vector<2x128xf32>
      %cst_44 = arith.constant dense<0.000000e+00> : vector<128xf32>
      %54 = vector.multi_reduction <add>, %53, %cst_44 [0] : vector<2x128xf32> to vector<128xf32>
      %55 = vector.shape_cast %54 : vector<128xf32> to vector<1x128xf32>
      %56 = arith.addf %arg8, %55 : vector<1x128xf32>
      scf.yield %52, %56 : vector<1x128xf32>, vector<1x128xf32>
    }
    %c2_i32_1 = arith.constant 2 : i32
    %4 = vector.shape_cast %3#0 : vector<1x128xf32> to vector<1x1x128xf32>
    %c0 = arith.constant 0 : index
    %c0_2 = arith.constant 0 : index
    %c0_3 = arith.constant 0 : index
    %5 = vector.load %arg4[%c0, %c0_2, %c0_3] : memref<1x1x128xf32, #tpu.memory_space<vmem>>, vector<1x1x128xf32>
    tpu.vector_store %arg4[%c0, %c0_2, %c0_3], %4 {strides = array<i32>} : memref<1x1x128xf32, #tpu.memory_space<vmem>>, vector<1x1x128xf32>,
    %6 = vector.shape_cast %3#1 : vector<1x128xf32> to vector<1x1x128xf32>
    %c0_4 = arith.constant 0 : index
    %c0_5 = arith.constant 0 : index
    %c0_6 = arith.constant 0 : index
    %7 = vector.load %arg5[%c0_4, %c0_5, %c0_6] : memref<1x1x128xf32, #tpu.memory_space<vmem>>, vector<1x1x128xf32>
    tpu.vector_store %arg5[%c0_4, %c0_5, %c0_6], %6 {strides = array<i32>} : memref<1x1x128xf32, #tpu.memory_space<vmem>>, vector<1x1x128xf32>,
    return
  }
  func.func @transform_0(%arg0: i32) -> (i32, i32, i32, i32) {
    %c0_i32 = arith.constant 0 : i32
    %c0_i32_0 = arith.constant 0 : i32
    %c0_i32_1 = arith.constant 0 : i32
    %c0_i32_2 = arith.constant 0 : i32
    return %arg0, %c0_i32, %c0_i32_0, %c0_i32_1 : i32, i32, i32, i32
  }
  func.func @transform_1(%arg0: i32) -> (i32, i32, i32) {
    %c0_i32 = arith.constant 0 : i32
    %c0_i32_0 = arith.constant 0 : i32
    %c0_i32_1 = arith.constant 0 : i32
    %c0_i32_2 = arith.constant 0 : i32
    return %c0_i32, %c0_i32_0, %c0_i32_1 : i32, i32, i32
  }
  func.func @transform_2(%arg0: i32) -> (i32, i32, i32, i32) {
    %c0_i32 = arith.constant 0 : i32
    %c0_i32_0 = arith.constant 0 : i32
    %c0_i32_1 = arith.constant 0 : i32
    %c0_i32_2 = arith.constant 0 : i32
    return %arg0, %c0_i32, %c0_i32_0, %c0_i32_1 : i32, i32, i32, i32
  }
  func.func @transform_3(%arg0: i32) -> (i32, i32, i32) {
    %c0_i32 = arith.constant 0 : i32
    %c0_i32_0 = arith.constant 0 : i32
    %c0_i32_1 = arith.constant 0 : i32
    return %arg0, %c0_i32, %c0_i32_0 : i32, i32, i32
  }
  func.func @transform_4(%arg0: i32) -> (i32, i32, i32) {
    %c0_i32 = arith.constant 0 : i32
    %c0_i32_0 = arith.constant 0 : i32
    %c0_i32_1 = arith.constant 0 : i32
    return %arg0, %c0_i32, %c0_i32_0 : i32, i32, i32
  }
}

</mosaic_0001>

<bundles_post_ra>
// kernel: d_patchgan_forward.7
= control target key start
LH: loop header
LB: loop body
LE: loop exit
PB: predicated region body
PF: predicated region fallthrough
CT: control target
= control target key end

     0   :  { %vm260_vm0 = vcmask 392192   ;;  %s1951_s1 = inlined_call_operand.vmem [shape: bf16[48,128], index: 1, kind: input, shape index: {}]   ;;  %s1952_s0 = inlined_call_operand.vmem [shape: bf16[512,48], index: 0, kind: input, shape index: {}]   ;;  %s1953_s2 = inlined_call_operand.vmem [shape: bf16[512,128], index: 2, kind: output, shape index: {}]  }
   0x1   :  { %v1659_v0 = vld [vmem:[%s1951_s1 + $0x10] sm:$0xff]   ;;  %v1660_v1 = vld [vmem:[%s1951_s1 + $0x8] sm:$0xff]   ;;  %v1661_v2 = vld [vmem:[%s1951_s1] sm:$0xff]  }
   0x2   :  { %1583 = vmatprep.subr.bf16.mxu0 %v1659_v0  ;;  %1653 = vmatprep.subr.bf16.mxu1 %v1659_v0  ;;  %v1662_v3 = vld [vmem:[%s1952_s0] sm:$0xff]   ;;  %v1664_v5 = vld [vmem:[%s1952_s0 + $0x8] sm:$0xff]   ;;  %v1666_v7 = vld [vmem:[%s1952_s0 + $0x10] sm:$0xff]  }
   0x3   :  { %1584 = vmatpush3.bf16.msra.mxu0 %v1659_v0  ;;  %1656 = vmatpush3.bf16.msra.mxu1 %v1659_v0  ;;  %v1663_v4 = vld [vmem:[%s1952_s0 + $0x80] sm:$0xff]   ;;  %v1665_v6 = vld [vmem:[%s1952_s0 + $0x88] sm:$0xff]   ;;  %v1667_v8 = vld [vmem:[%s1952_s0 + $0x90] sm:$0xff]  }
   0x4   :  { %1585 = vmatprep.subr.bf16.mxu0 %v1660_v1  ;;  %1654 = vmatprep.subr.bf16.mxu1 %v1660_v1  ;;  %v1668_v9 = vld [vmem:[%s1952_s0 + $0x18] sm:$0xff]   ;;  %v1670_v11 = vld [vmem:[%s1952_s0 + $0x20] sm:$0xff]   ;;  %v1672_v13 = vld [vmem:[%s1952_s0 + $0x28] sm:$0xff]  }
   0x5   :  { %1589 = vmatprep.mubr.msk.bf16.mxu0 %vm260_vm0, %v1662_v3  ;;  %1621 = vmatprep.mubr.msk.bf16.mxu1 %vm260_vm0, %v1663_v4  ;;  %v1669_v10 = vld [vmem:[%s1952_s0 + $0x98] sm:$0xff]   ;;  %v1671_v12 = vld [vmem:[%s1952_s0 + $0xa0] sm:$0xff]   ;;  %v1673_v14 = vld [vmem:[%s1952_s0 + $0xa8] sm:$0xff]  }
   0x6   :  { %v1674_v15 = vld [vmem:[%s1952_s0 + $0x30] sm:$0xff]   ;;  %v1676_v17 = vld [vmem:[%s1952_s0 + $0x38] sm:$0xff]   ;;  %v1678_v19 = vld [vmem:[%s1952_s0 + $0x40] sm:$0xff]  }
   0x7   :  { %1586 = vmatpush3.bf16.msra.mxu0 %v1660_v1  ;;  %1657 = vmatpush3.bf16.msra.mxu1 %v1660_v1  ;;  %v1675_v16 = vld [vmem:[%s1952_s0 + $0xb0] sm:$0xff]   ;;  %v1677_v18 = vld [vmem:[%s1952_s0 + $0xb8] sm:$0xff]   ;;  %v1679_v20 = vld [vmem:[%s1952_s0 + $0xc0] sm:$0xff]  }
   0x8   :  { %1587 = vmatprep.subr.bf16.mxu0 %v1661_v2  ;;  %1655 = vmatprep.subr.bf16.mxu1 %v1661_v2  ;;  %v1680_v21 = vld [vmem:[%s1952_s0 + $0x48] sm:$0xff]   ;;  %v1682_v23 = vld [vmem:[%s1952_s0 + $0x50] sm:$0xff]   ;;  %v1684_v25 = vld [vmem:[%s1952_s0 + $0x58] sm:$0xff]  }
   0x9   :  { %v1681_v22 = vld [vmem:[%s1952_s0 + $0xc8] sm:$0xff]   ;;  %v1683_v24 = vld [vmem:[%s1952_s0 + $0xd0] sm:$0xff]   ;;  %v1685_v26 = vld [vmem:[%s1952_s0 + $0xd8] sm:$0xff]  }
   0xa   :  { %v1686_v27 = vld [vmem:[%s1952_s0 + $0x60] sm:$0xff]   ;;  %v1688_v29 = vld [vmem:[%s1952_s0 + $0x68] sm:$0xff]   ;;  %v1690_v31 = vld [vmem:[%s1952_s0 + $0x70] sm:$0xff]  }
   0xb   :  { %1588 = vmatpush3.bf16.msra.mxu0 %v1661_v2  ;;  %1658 = vmatpush3.bf16.msra.mxu1 %v1661_v2  ;;  %v1687_v28 = vld [vmem:[%s1952_s0 + $0xe0] sm:$0xff]   ;;  %v1689_v30 = vld [vmem:[%s1952_s0 + $0xe8] sm:$0xff]   ;;  %v1691_v32 = vld [vmem:[%s1952_s0 + $0xf0] sm:$0xff]  }
   0xc   :  { %v1692_v33 = vld [vmem:[%s1952_s0 + $0x78] sm:$0xff]  }
   0xd   :  { %v1693_v34 = vld [vmem:[%s1952_s0 + $0xf8] sm:$0xff]  }
   0xe   :  { %1590 = vmatmul.mubr.msk.bf16.vlgmr.msra.gmra.mxu0 %vm260_vm0, %v1664_v5  ;;  %1622 = vmatmul.mubr.msk.bf16.vlgmr.msra.gmra.mxu1 %vm260_vm0, %v1665_v6 }
   0xf   :  { %1593 = vmatprep.mubr.msk.bf16.mxu0 %vm260_vm0, %v1666_v7  ;;  %1625 = vmatprep.mubr.msk.bf16.mxu1 %vm260_vm0, %v1667_v8 }
  0x16   :  { %1594 = vmatmul.mubr.msk.bf16.gmra.mxu0 %vm260_vm0, %v1668_v9  ;;  %1626 = vmatmul.mubr.msk.bf16.gmra.mxu1 %vm260_vm0, %v1669_v10 }
  0x17   :  { %1597 = vmatprep.mubr.msk.bf16.mxu0 %vm260_vm0, %v1670_v11  ;;  %1629 = vmatprep.mubr.msk.bf16.mxu1 %vm260_vm0, %v1671_v12 }
  0x1e   :  { %1598 = vmatmul.mubr.msk.bf16.gmra.mxu0 %vm260_vm0, %v1672_v13  ;;  %1630 = vmatmul.mubr.msk.bf16.gmra.mxu1 %vm260_vm0, %v1673_v14 }
  0x1f   :  { %1601 = vmatprep.mubr.msk.bf16.mxu0 %vm260_vm0, %v1674_v15  ;;  %1633 = vmatprep.mubr.msk.bf16.mxu1 %vm260_vm0, %v1675_v16 }
  0x26   :  { %1602 = vmatmul.mubr.msk.bf16.gmra.mxu0 %vm260_vm0, %v1676_v17  ;;  %1634 = vmatmul.mubr.msk.bf16.gmra.mxu1 %vm260_vm0, %v1677_v18 }
  0x27   :  { %1605 = vmatprep.mubr.msk.bf16.mxu0 %vm260_vm0, %v1678_v19  ;;  %1637 = vmatprep.mubr.msk.bf16.mxu1 %vm260_vm0, %v1679_v20 }
  0x2e   :  { %1606 = vmatmul.mubr.msk.bf16.gmra.mxu0 %vm260_vm0, %v1680_v21  ;;  %1638 = vmatmul.mubr.msk.bf16.gmra.mxu1 %vm260_vm0, %v1681_v22 }
  0x2f   :  { %1609 = vmatprep.mubr.msk.bf16.mxu0 %vm260_vm0, %v1682_v23  ;;  %1641 = vmatprep.mubr.msk.bf16.mxu1 %vm260_vm0, %v1683_v24 }
  0x36   :  { %1610 = vmatmul.mubr.msk.bf16.gmra.mxu0 %vm260_vm0, %v1684_v25  ;;  %1642 = vmatmul.mubr.msk.bf16.gmra.mxu1 %vm260_vm0, %v1685_v26 }
  0x37   :  { %1613 = vmatprep.mubr.msk.bf16.mxu0 %vm260_vm0, %v1686_v27  ;;  %1645 = vmatprep.mubr.msk.bf16.mxu1 %vm260_vm0, %v1687_v28 }
  0x3e   :  { %1614 = vmatmul.mubr.msk.bf16.gmra.mxu0 %vm260_vm0, %v1688_v29  ;;  %1646 = vmatmul.mubr.msk.bf16.gmra.mxu1 %vm260_vm0, %v1689_v30 }
  0x3f   :  { %1617 = vmatprep.mubr.msk.bf16.mxu0 %vm260_vm0, %v1690_v31  ;;  %1649 = vmatprep.mubr.msk.bf16.mxu1 %vm260_vm0, %v1691_v32 }
  0x46   :  { %1618 = vmatmul.mubr.msk.bf16.gmra.mxu0 %vm260_vm0, %v1692_v33  ;;  %1650 = vmatmul.mubr.msk.bf16.gmra.mxu1 %vm260_vm0, %v1693_v34 }
  0xce   :  { %v1591_v35 = vpop.f32.mrf.mxu0  ;;  %v1623_v36 = vpop.f32.mrf.mxu1 }
  0xcf   :  { %vm648_vm1 = vcmp.gt.f32.partialorder %v1591_v35, 0.0  ;;  %v712_v37 = vmul.f32 0.2, %v1591_v35  ;;  %v744_v38 = vmul.f32 0.2, %v1623_v36  ;;  %vm680_vm2 = vcmp.gt.f32.partialorder %v1623_v36, 0.0 }
  0xd0   :  { %v391_v39 = vpop.f32.mrf.mxu0  ;;  %v519_v40 = vpop.f32.mrf.mxu1 }
  0xd1   :  { %v776_v41 = vsel %vm648_vm1, %v1591_v35, %v712_v37  ;;  %v710_v42 = vmul.f32 0.2, %v391_v39  ;;  %vm646_vm3 = vcmp.gt.f32.partialorder %v391_v39, 0.0  ;;  %v808_v46 = vsel %vm680_vm2, %v1623_v36, %v744_v38 }
  0xd2   :  { %v1592_v43 = vpop.f32.mrf.mxu0  ;;  %v1624_v44 = vpop.f32.mrf.mxu1  ;;  %vm678_vm6 = vcmp.gt.f32.partialorder %v519_v40, 0.0  ;;  %v742_v47 = vmul.f32 0.2, %v519_v40 }
  0xd3   :  { %vm649_vm4 = vcmp.gt.f32.partialorder %v1592_v43, 0.0  ;;  %v713_v45 = vmul.f32 0.2, %v1592_v43  ;;  %vm681_vm5 = vcmp.gt.f32.partialorder %v1624_v44, 0.0  ;;  %v745_v48 = vmul.f32 0.2, %v1624_v44 }
  0xd4   :  { %v394_v49 = vpop.f32.mrf.mxu0  ;;  %v522_v50 = vpop.f32.mrf.mxu1  ;;  %v774_v53 = vsel %vm646_vm3, %v391_v39, %v710_v42  ;;  %v806_v62 = vsel %vm678_vm6, %v519_v40, %v742_v47 }
  0xd5   :  { %v777_v51 = vsel %vm649_vm4, %v1592_v43, %v713_v45  ;;  %vm647_vm7 = vcmp.gt.f32.partialorder %v394_v49, 0.0  ;;  %v711_v52 = vmul.f32 0.2, %v394_v49  ;;  %vm679_vm8 = vcmp.gt.f32.partialorder %v522_v50, 0.0 }
  0xd6   :  { %v1365_v54 = vpack.c.bf16 %v777_v51, %v776_v41  ;;  %v809_v55 = vsel %vm681_vm5, %v1624_v44, %v745_v48  ;;  %v743_v56 = vmul.f32 0.2, %v522_v50  ;;  %v1595_v57 = vpop.f32.mrf.mxu0  ;;  %v1627_v58 = vpop.f32.mrf.mxu1 }
  0xd7   :  { %v1445_v59 = vpack.c.bf16 %v809_v55, %v808_v46  ;;  %v775_v60 = vsel %vm647_vm7, %v394_v49, %v711_v52  ;;  %vm652_vm9 = vcmp.gt.f32.partialorder %v1595_v57, 0.0  ;;  %v716_v61 = vmul.f32 0.2, %v1595_v57 }
  0xd8   :  { %1517 = vst [vmem:[%s1953_s2 + $0x8] sm:$0xff] %v1365_v54   ;;  %v1360_v63 = vpack.c.bf16 %v775_v60, %v774_v53  ;;  %v807_v0 = vsel %vm679_vm8, %v522_v50, %v743_v56  ;;  %v748_v1 = vmul.f32 0.2, %v1627_v58  ;;  %v407_v2 = vpop.f32.mrf.mxu0  ;;  %v535_v3 = vpop.f32.mrf.mxu1  ;;  %vm684_vm10 = vcmp.gt.f32.partialorder %v1627_v58, 0.0 }
  0xd9   :  { %1533 = vst [vmem:[%s1953_s2 + $0x88] sm:$0xff] %v1445_v59   ;;  %v1440_v4 = vpack.c.bf16 %v807_v0, %v806_v62  ;;  %v780_v5 = vsel %vm652_vm9, %v1595_v57, %v716_v61  ;;  %v714_v6 = vmul.f32 0.2, %v407_v2  ;;  %vm650_vm11 = vcmp.gt.f32.partialorder %v407_v2, 0.0 }
  0xda   :  { %1361 = vst [vmem:[%s1953_s2] sm:$0xff] %v1360_v63   ;;  %v1596_v7 = vpop.f32.mrf.mxu0  ;;  %v1628_v8 = vpop.f32.mrf.mxu1  ;;  %v812_v10 = vsel %vm684_vm10, %v1627_v58, %v748_v1  ;;  %vm682_vm14 = vcmp.gt.f32.partialorder %v535_v3, 0.0  ;;  %v746_v11 = vmul.f32 0.2, %v535_v3 }
  0xdb   :  { %1532 = vst [vmem:[%s1953_s2 + $0x80] sm:$0xff] %v1440_v4   ;;  %vm653_vm12 = vcmp.gt.f32.partialorder %v1596_v7, 0.0  ;;  %v717_v9 = vmul.f32 0.2, %v1596_v7  ;;  %vm685_vm13 = vcmp.gt.f32.partialorder %v1628_v8, 0.0  ;;  %v778_v17 = vsel %vm650_vm11, %v407_v2, %v714_v6 }
  0xdc   :  { %v749_v12 = vmul.f32 0.2, %v1628_v8  ;;  %v410_v13 = vpop.f32.mrf.mxu0  ;;  %v538_v14 = vpop.f32.mrf.mxu1  ;;  %v810_v26 = vsel %vm682_vm14, %v535_v3, %v746_v11 }
  0xdd   :  { %v781_v15 = vsel %vm653_vm12, %v1596_v7, %v717_v9  ;;  %vm651_vm15 = vcmp.gt.f32.partialorder %v410_v13, 0.0  ;;  %v715_v16 = vmul.f32 0.2, %v410_v13  ;;  %vm683_vm0 = vcmp.gt.f32.partialorder %v538_v14, 0.0 }
  0xde   :  { %v1375_v18 = vpack.c.bf16 %v781_v15, %v780_v5  ;;  %v813_v19 = vsel %vm685_vm13, %v1628_v8, %v749_v12  ;;  %v747_v20 = vmul.f32 0.2, %v538_v14  ;;  %v1599_v21 = vpop.f32.mrf.mxu0  ;;  %v1631_v22 = vpop.f32.mrf.mxu1 }
  0xdf   :  { %v1455_v23 = vpack.c.bf16 %v813_v19, %v812_v10  ;;  %v779_v24 = vsel %vm651_vm15, %v410_v13, %v715_v16  ;;  %vm656_vm1 = vcmp.gt.f32.partialorder %v1599_v21, 0.0  ;;  %v720_v25 = vmul.f32 0.2, %v1599_v21 }
  0xe0   :  { %1519 = vst [vmem:[%s1953_s2 + $0x18] sm:$0xff] %v1375_v18   ;;  %v1370_v27 = vpack.c.bf16 %v779_v24, %v778_v17  ;;  %v811_v28 = vsel %vm683_vm0, %v538_v14, %v747_v20  ;;  %v752_v29 = vmul.f32 0.2, %v1631_v22  ;;  %v423_v30 = vpop.f32.mrf.mxu0  ;;  %v551_v31 = vpop.f32.mrf.mxu1  ;;  %vm688_vm2 = vcmp.gt.f32.partialorder %v1631_v22, 0.0 }
  0xe1   :  { %1535 = vst [vmem:[%s1953_s2 + $0x98] sm:$0xff] %v1455_v23   ;;  %v1450_v32 = vpack.c.bf16 %v811_v28, %v810_v26  ;;  %v784_v33 = vsel %vm656_vm1, %v1599_v21, %v720_v25  ;;  %v718_v34 = vmul.f32 0.2, %v423_v30  ;;  %vm654_vm3 = vcmp.gt.f32.partialorder %v423_v30, 0.0 }
  0xe2   :  { %1518 = vst [vmem:[%s1953_s2 + $0x10] sm:$0xff] %v1370_v27   ;;  %v1600_v35 = vpop.f32.mrf.mxu0  ;;  %v1632_v36 = vpop.f32.mrf.mxu1  ;;  %v816_v38 = vsel %vm688_vm2, %v1631_v22, %v752_v29  ;;  %vm686_vm6 = vcmp.gt.f32.partialorder %v551_v31, 0.0  ;;  %v750_v39 = vmul.f32 0.2, %v551_v31 }
  0xe3   :  { %1534 = vst [vmem:[%s1953_s2 + $0x90] sm:$0xff] %v1450_v32   ;;  %vm657_vm4 = vcmp.gt.f32.partialorder %v1600_v35, 0.0  ;;  %v721_v37 = vmul.f32 0.2, %v1600_v35  ;;  %vm689_vm5 = vcmp.gt.f32.partialorder %v1632_v36, 0.0  ;;  %v782_v45 = vsel %vm654_vm3, %v423_v30, %v718_v34 }
  0xe4   :  { %v753_v40 = vmul.f32 0.2, %v1632_v36  ;;  %v426_v41 = vpop.f32.mrf.mxu0  ;;  %v554_v42 = vpop.f32.mrf.mxu1  ;;  %v814_v54 = vsel %vm686_vm6, %v551_v31, %v750_v39 }
  0xe5   :  { %v785_v43 = vsel %vm657_vm4, %v1600_v35, %v721_v37  ;;  %vm655_vm7 = vcmp.gt.f32.partialorder %v426_v41, 0.0  ;;  %v719_v44 = vmul.f32 0.2, %v426_v41  ;;  %vm687_vm8 = vcmp.gt.f32.partialorder %v554_v42, 0.0 }
  0xe6   :  { %v1385_v46 = vpack.c.bf16 %v785_v43, %v784_v33  ;;  %v817_v47 = vsel %vm689_vm5, %v1632_v36, %v753_v40  ;;  %v751_v48 = vmul.f32 0.2, %v554_v42  ;;  %v1603_v49 = vpop.f32.mrf.mxu0  ;;  %v1635_v50 = vpop.f32.mrf.mxu1 }
  0xe7   :  { %v1465_v51 = vpack.c.bf16 %v817_v47, %v816_v38  ;;  %v783_v52 = vsel %vm655_vm7, %v426_v41, %v719_v44  ;;  %vm660_vm9 = vcmp.gt.f32.partialorder %v1603_v49, 0.0  ;;  %v724_v53 = vmul.f32 0.2, %v1603_v49 }
  0xe8   :  { %1521 = vst [vmem:[%s1953_s2 + $0x28] sm:$0xff] %v1385_v46   ;;  %v1380_v55 = vpack.c.bf16 %v783_v52, %v782_v45  ;;  %v815_v56 = vsel %vm687_vm8, %v554_v42, %v751_v48  ;;  %v756_v57 = vmul.f32 0.2, %v1635_v50  ;;  %v439_v58 = vpop.f32.mrf.mxu0  ;;  %v567_v59 = vpop.f32.mrf.mxu1  ;;  %vm692_vm10 = vcmp.gt.f32.partialorder %v1635_v50, 0.0 }
  0xe9   :  { %1537 = vst [vmem:[%s1953_s2 + $0xa8] sm:$0xff] %v1465_v51   ;;  %v1460_v60 = vpack.c.bf16 %v815_v56, %v814_v54  ;;  %v788_v61 = vsel %vm660_vm9, %v1603_v49, %v724_v53  ;;  %v722_v62 = vmul.f32 0.2, %v439_v58  ;;  %vm658_vm11 = vcmp.gt.f32.partialorder %v439_v58, 0.0 }
  0xea   :  { %1520 = vst [vmem:[%s1953_s2 + $0x20] sm:$0xff] %v1380_v55   ;;  %v1604_v63 = vpop.f32.mrf.mxu0  ;;  %v1636_v0 = vpop.f32.mrf.mxu1  ;;  %v820_v2 = vsel %vm692_vm10, %v1635_v50, %v756_v57  ;;  %vm690_vm14 = vcmp.gt.f32.partialorder %v567_v59, 0.0  ;;  %v754_v3 = vmul.f32 0.2, %v567_v59 }
  0xeb   :  { %1536 = vst [vmem:[%s1953_s2 + $0xa0] sm:$0xff] %v1460_v60   ;;  %vm661_vm12 = vcmp.gt.f32.partialorder %v1604_v63, 0.0  ;;  %v725_v1 = vmul.f32 0.2, %v1604_v63  ;;  %vm693_vm13 = vcmp.gt.f32.partialorder %v1636_v0, 0.0  ;;  %v786_v9 = vsel %vm658_vm11, %v439_v58, %v722_v62 }
  0xec   :  { %v757_v4 = vmul.f32 0.2, %v1636_v0  ;;  %v442_v5 = vpop.f32.mrf.mxu0  ;;  %v570_v6 = vpop.f32.mrf.mxu1  ;;  %v818_v18 = vsel %vm690_vm14, %v567_v59, %v754_v3 }
  0xed   :  { %v789_v7 = vsel %vm661_vm12, %v1604_v63, %v725_v1  ;;  %vm659_vm15 = vcmp.gt.f32.partialorder %v442_v5, 0.0  ;;  %v723_v8 = vmul.f32 0.2, %v442_v5  ;;  %vm691_vm0 = vcmp.gt.f32.partialorder %v570_v6, 0.0 }
  0xee   :  { %v1395_v10 = vpack.c.bf16 %v789_v7, %v788_v61  ;;  %v821_v11 = vsel %vm693_vm13, %v1636_v0, %v757_v4  ;;  %v755_v12 = vmul.f32 0.2, %v570_v6  ;;  %v1607_v13 = vpop.f32.mrf.mxu0  ;;  %v1639_v14 = vpop.f32.mrf.mxu1 }
  0xef   :  { %v1475_v15 = vpack.c.bf16 %v821_v11, %v820_v2  ;;  %v787_v16 = vsel %vm659_vm15, %v442_v5, %v723_v8  ;;  %vm664_vm1 = vcmp.gt.f32.partialorder %v1607_v13, 0.0  ;;  %v728_v17 = vmul.f32 0.2, %v1607_v13 }
  0xf0   :  { %1523 = vst [vmem:[%s1953_s2 + $0x38] sm:$0xff] %v1395_v10   ;;  %v1390_v19 = vpack.c.bf16 %v787_v16, %v786_v9  ;;  %v819_v20 = vsel %vm691_vm0, %v570_v6, %v755_v12  ;;  %v760_v21 = vmul.f32 0.2, %v1639_v14  ;;  %v455_v22 = vpop.f32.mrf.mxu0  ;;  %v583_v23 = vpop.f32.mrf.mxu1  ;;  %vm696_vm2 = vcmp.gt.f32.partialorder %v1639_v14, 0.0 }
  0xf1   :  { %1539 = vst [vmem:[%s1953_s2 + $0xb8] sm:$0xff] %v1475_v15   ;;  %v1470_v24 = vpack.c.bf16 %v819_v20, %v818_v18  ;;  %v792_v25 = vsel %vm664_vm1, %v1607_v13, %v728_v17  ;;  %v726_v26 = vmul.f32 0.2, %v455_v22  ;;  %vm662_vm3 = vcmp.gt.f32.partialorder %v455_v22, 0.0 }
  0xf2   :  { %1522 = vst [vmem:[%s1953_s2 + $0x30] sm:$0xff] %v1390_v19   ;;  %v1608_v27 = vpop.f32.mrf.mxu0  ;;  %v1640_v28 = vpop.f32.mrf.mxu1  ;;  %v824_v30 = vsel %vm696_vm2, %v1639_v14, %v760_v21  ;;  %vm694_vm6 = vcmp.gt.f32.partialorder %v583_v23, 0.0  ;;  %v758_v31 = vmul.f32 0.2, %v583_v23 }
  0xf3   :  { %1538 = vst [vmem:[%s1953_s2 + $0xb0] sm:$0xff] %v1470_v24   ;;  %vm665_vm4 = vcmp.gt.f32.partialorder %v1608_v27, 0.0  ;;  %v729_v29 = vmul.f32 0.2, %v1608_v27  ;;  %vm697_vm5 = vcmp.gt.f32.partialorder %v1640_v28, 0.0  ;;  %v790_v37 = vsel %vm662_vm3, %v455_v22, %v726_v26 }
  0xf4   :  { %v761_v32 = vmul.f32 0.2, %v1640_v28  ;;  %v458_v33 = vpop.f32.mrf.mxu0  ;;  %v586_v34 = vpop.f32.mrf.mxu1  ;;  %v822_v46 = vsel %vm694_vm6, %v583_v23, %v758_v31 }
  0xf5   :  { %v793_v35 = vsel %vm665_vm4, %v1608_v27, %v729_v29  ;;  %vm663_vm7 = vcmp.gt.f32.partialorder %v458_v33, 0.0  ;;  %v727_v36 = vmul.f32 0.2, %v458_v33  ;;  %vm695_vm8 = vcmp.gt.f32.partialorder %v586_v34, 0.0 }
  0xf6   :  { %v1405_v38 = vpack.c.bf16 %v793_v35, %v792_v25  ;;  %v825_v39 = vsel %vm697_vm5, %v1640_v28, %v761_v32  ;;  %v759_v40 = vmul.f32 0.2, %v586_v34  ;;  %v1611_v41 = vpop.f32.mrf.mxu0  ;;  %v1643_v42 = vpop.f32.mrf.mxu1 }
  0xf7   :  { %v1485_v43 = vpack.c.bf16 %v825_v39, %v824_v30  ;;  %v791_v44 = vsel %vm663_vm7, %v458_v33, %v727_v36  ;;  %vm668_vm9 = vcmp.gt.f32.partialorder %v1611_v41, 0.0  ;;  %v732_v45 = vmul.f32 0.2, %v1611_v41 }
  0xf8   :  { %1525 = vst [vmem:[%s1953_s2 + $0x48] sm:$0xff] %v1405_v38   ;;  %v1400_v47 = vpack.c.bf16 %v791_v44, %v790_v37  ;;  %v823_v48 = vsel %vm695_vm8, %v586_v34, %v759_v40  ;;  %v764_v49 = vmul.f32 0.2, %v1643_v42  ;;  %v471_v50 = vpop.f32.mrf.mxu0  ;;  %v599_v51 = vpop.f32.mrf.mxu1  ;;  %vm700_vm10 = vcmp.gt.f32.partialorder %v1643_v42, 0.0 }
  0xf9   :  { %1541 = vst [vmem:[%s1953_s2 + $0xc8] sm:$0xff] %v1485_v43   ;;  %v1480_v52 = vpack.c.bf16 %v823_v48, %v822_v46  ;;  %v796_v53 = vsel %vm668_vm9, %v1611_v41, %v732_v45  ;;  %v730_v54 = vmul.f32 0.2, %v471_v50  ;;  %vm666_vm11 = vcmp.gt.f32.partialorder %v471_v50, 0.0 }
  0xfa   :  { %1524 = vst [vmem:[%s1953_s2 + $0x40] sm:$0xff] %v1400_v47   ;;  %v1612_v55 = vpop.f32.mrf.mxu0  ;;  %v1644_v56 = vpop.f32.mrf.mxu1  ;;  %v828_v58 = vsel %vm700_vm10, %v1643_v42, %v764_v49  ;;  %vm698_vm14 = vcmp.gt.f32.partialorder %v599_v51, 0.0  ;;  %v762_v59 = vmul.f32 0.2, %v599_v51 }
  0xfb   :  { %1540 = vst [vmem:[%s1953_s2 + $0xc0] sm:$0xff] %v1480_v52   ;;  %vm669_vm12 = vcmp.gt.f32.partialorder %v1612_v55, 0.0  ;;  %v733_v57 = vmul.f32 0.2, %v1612_v55  ;;  %vm701_vm13 = vcmp.gt.f32.partialorder %v1644_v56, 0.0  ;;  %v794_v1 = vsel %vm666_vm11, %v471_v50, %v730_v54 }
  0xfc   :  { %v765_v60 = vmul.f32 0.2, %v1644_v56  ;;  %v474_v61 = vpop.f32.mrf.mxu0  ;;  %v602_v62 = vpop.f32.mrf.mxu1  ;;  %v826_v10 = vsel %vm698_vm14, %v599_v51, %v762_v59 }
  0xfd   :  { %v797_v63 = vsel %vm669_vm12, %v1612_v55, %v733_v57  ;;  %vm667_vm15 = vcmp.gt.f32.partialorder %v474_v61, 0.0  ;;  %v731_v0 = vmul.f32 0.2, %v474_v61  ;;  %vm699_vm0 = vcmp.gt.f32.partialorder %v602_v62, 0.0 }
  0xfe   :  { %v1415_v2 = vpack.c.bf16 %v797_v63, %v796_v53  ;;  %v829_v3 = vsel %vm701_vm13, %v1644_v56, %v765_v60  ;;  %v763_v4 = vmul.f32 0.2, %v602_v62  ;;  %v1615_v5 = vpop.f32.mrf.mxu0  ;;  %v1647_v6 = vpop.f32.mrf.mxu1 }
  0xff   :  { %v1495_v7 = vpack.c.bf16 %v829_v3, %v828_v58  ;;  %v795_v8 = vsel %vm667_vm15, %v474_v61, %v731_v0  ;;  %vm672_vm1 = vcmp.gt.f32.partialorder %v1615_v5, 0.0  ;;  %v736_v9 = vmul.f32 0.2, %v1615_v5 }
 0x100   :  { %1527 = vst [vmem:[%s1953_s2 + $0x58] sm:$0xff] %v1415_v2   ;;  %v1410_v11 = vpack.c.bf16 %v795_v8, %v794_v1  ;;  %v827_v12 = vsel %vm699_vm0, %v602_v62, %v763_v4  ;;  %v768_v13 = vmul.f32 0.2, %v1647_v6  ;;  %v487_v14 = vpop.f32.mrf.mxu0  ;;  %v615_v15 = vpop.f32.mrf.mxu1  ;;  %vm704_vm2 = vcmp.gt.f32.partialorder %v1647_v6, 0.0 }
 0x101   :  { %1543 = vst [vmem:[%s1953_s2 + $0xd8] sm:$0xff] %v1495_v7   ;;  %v1490_v16 = vpack.c.bf16 %v827_v12, %v826_v10  ;;  %v800_v17 = vsel %vm672_vm1, %v1615_v5, %v736_v9  ;;  %v734_v18 = vmul.f32 0.2, %v487_v14  ;;  %vm670_vm3 = vcmp.gt.f32.partialorder %v487_v14, 0.0 }
 0x102   :  { %1526 = vst [vmem:[%s1953_s2 + $0x50] sm:$0xff] %v1410_v11   ;;  %v1616_v19 = vpop.f32.mrf.mxu0  ;;  %v1648_v20 = vpop.f32.mrf.mxu1  ;;  %v832_v22 = vsel %vm704_vm2, %v1647_v6, %v768_v13  ;;  %vm702_vm6 = vcmp.gt.f32.partialorder %v615_v15, 0.0  ;;  %v766_v23 = vmul.f32 0.2, %v615_v15 }
 0x103   :  { %1542 = vst [vmem:[%s1953_s2 + $0xd0] sm:$0xff] %v1490_v16   ;;  %vm673_vm4 = vcmp.gt.f32.partialorder %v1616_v19, 0.0  ;;  %v737_v21 = vmul.f32 0.2, %v1616_v19  ;;  %vm705_vm5 = vcmp.gt.f32.partialorder %v1648_v20, 0.0  ;;  %v798_v29 = vsel %vm670_vm3, %v487_v14, %v734_v18 }
 0x104   :  { %v769_v24 = vmul.f32 0.2, %v1648_v20  ;;  %v490_v25 = vpop.f32.mrf.mxu0  ;;  %v618_v26 = vpop.f32.mrf.mxu1  ;;  %v830_v38 = vsel %vm702_vm6, %v615_v15, %v766_v23 }
 0x105   :  { %v801_v27 = vsel %vm673_vm4, %v1616_v19, %v737_v21  ;;  %vm671_vm7 = vcmp.gt.f32.partialorder %v490_v25, 0.0  ;;  %v735_v28 = vmul.f32 0.2, %v490_v25  ;;  %vm703_vm8 = vcmp.gt.f32.partialorder %v618_v26, 0.0 }
 0x106   :  { %v1425_v30 = vpack.c.bf16 %v801_v27, %v800_v17  ;;  %v833_v31 = vsel %vm705_vm5, %v1648_v20, %v769_v24  ;;  %v767_v32 = vmul.f32 0.2, %v618_v26  ;;  %v1619_v33 = vpop.f32.mrf.mxu0  ;;  %v1651_v34 = vpop.f32.mrf.mxu1 }
 0x107   :  { %v1505_v35 = vpack.c.bf16 %v833_v31, %v832_v22  ;;  %v799_v36 = vsel %vm671_vm7, %v490_v25, %v735_v28  ;;  %vm676_vm9 = vcmp.gt.f32.partialorder %v1619_v33, 0.0  ;;  %v740_v37 = vmul.f32 0.2, %v1619_v33 }
 0x108   :  { %1529 = vst [vmem:[%s1953_s2 + $0x68] sm:$0xff] %v1425_v30   ;;  %v1420_v39 = vpack.c.bf16 %v799_v36, %v798_v29  ;;  %v831_v40 = vsel %vm703_vm8, %v618_v26, %v767_v32  ;;  %v503_v41 = vpop.f32.mrf.mxu0  ;;  %v631_v42 = vpop.f32.mrf.mxu1  ;;  %vm708_vm10 = vcmp.gt.f32.partialorder %v1651_v34, 0.0  ;;  %v772_v45 = vmul.f32 0.2, %v1651_v34 }
 0x109   :  { %1545 = vst [vmem:[%s1953_s2 + $0xe8] sm:$0xff] %v1505_v35   ;;  %v1500_v43 = vpack.c.bf16 %v831_v40, %v830_v38  ;;  %v804_v44 = vsel %vm676_vm9, %v1619_v33, %v740_v37  ;;  %v738_v48 = vmul.f32 0.2, %v503_v41  ;;  %vm674_vm13 = vcmp.gt.f32.partialorder %v503_v41, 0.0 }
 0x10a   :  { %1528 = vst [vmem:[%s1953_s2 + $0x60] sm:$0xff] %v1420_v39   ;;  %v1620_v46 = vpop.f32.mrf.mxu0  ;;  %v1652_v47 = vpop.f32.mrf.mxu1  ;;  %vm706_vm14 = vcmp.gt.f32.partialorder %v631_v42, 0.0  ;;  %v770_v50 = vmul.f32 0.2, %v631_v42  ;;  %v836_v56 = vsel %vm708_vm10, %v1651_v34, %v772_v45 }
 0x10b   :  { %1544 = vst [vmem:[%s1953_s2 + $0xe0] sm:$0xff] %v1500_v43   ;;  %vm677_vm11 = vcmp.gt.f32.partialorder %v1620_v46, 0.0  ;;  %v741_v49 = vmul.f32 0.2, %v1620_v46  ;;  %vm709_vm12 = vcmp.gt.f32.partialorder %v1652_v47, 0.0  ;;  %v802_v60 = vsel %vm674_vm13, %v503_v41, %v738_v48 }
 0x10c   :  { %v773_v51 = vmul.f32 0.2, %v1652_v47  ;;  %v506_v52 = vpop.f32.mrf.mxu0  ;;  %v634_v53 = vpop.f32.mrf.mxu1  ;;  %v834_v63 = vsel %vm706_vm14, %v631_v42, %v770_v50 }
 0x10d   :  { %v805_v54 = vsel %vm677_vm11, %v1620_v46, %v741_v49  ;;  %vm675_vm15 = vcmp.gt.f32.partialorder %v506_v52, 0.0  ;;  %v739_v55 = vmul.f32 0.2, %v506_v52  ;;  %vm707_vm0 = vcmp.gt.f32.partialorder %v634_v53, 0.0 }
 0x10e   :  { %v1435_v57 = vpack.c.bf16 %v805_v54, %v804_v44  ;;  %v837_v58 = vsel %vm709_vm12, %v1652_v47, %v773_v51  ;;  %v771_v59 = vmul.f32 0.2, %v634_v53 }
 0x10f   :  { %v1515_v61 = vpack.c.bf16 %v837_v58, %v836_v56  ;;  %v803_v62 = vsel %vm675_vm15, %v506_v52, %v739_v55 }
 0x110   :  { %1531 = vst [vmem:[%s1953_s2 + $0x78] sm:$0xff] %v1435_v57   ;;  %v1430_v0 = vpack.c.bf16 %v803_v62, %v802_v60  ;;  %v835_v1 = vsel %vm707_vm0, %v634_v53, %v771_v59 }
 0x111   :  { %1547 = vst [vmem:[%s1953_s2 + $0xf8] sm:$0xff] %v1515_v61   ;;  %v1510_v2 = vpack.c.bf16 %v835_v1, %v834_v63 }
 0x112   :  { %1530 = vst [vmem:[%s1953_s2 + $0x70] sm:$0xff] %v1430_v0  }
 0x113   :  { %1546 = vst [vmem:[%s1953_s2 + $0xf0] sm:$0xff] %v1510_v2  }

// kernel: d_patchgan_forward.8
= control target key start
LH: loop header
LB: loop body
LE: loop exit
PB: predicated region body
PF: predicated region fallthrough
CT: control target
= control target key end

     0   :  { %s820_s15 = smov 0   ;;  %s926_s0 = inlined_call_operand.vmem [shape: bf16[2,18,8,32], index: 0, kind: input, shape index: {}]   ;;  %s927_s1 = inlined_call_operand.vmem [shape: bf16[4,32,128], index: 1, kind: input, shape index: {}]   ;;  %s928_s2 = inlined_call_operand.vmem [shape: bf16[2,8,8,128], index: 2, kind: output, shape index: {0}]   ;;  %s929_s3 = inlined_call_operand.vmem [shape: f32[2,1,128], index: 3, kind: output, shape index: {1}]   ;;  %s930_s4 = inlined_call_operand.vmem [shape: f32[2,1,128], index: 4, kind: output, shape index: {2}]  }
   0x1 LB: > { %s631_s16 = sadd.s32 4294967295, %s779_s15   ;;  %p635_p0 = scmp.ge.s32.totalorder %s779_s15, 1  ;;  %s779_s15 = sphi %s820_s15, %s15_s15  }
   0x2   : > { %p167_p1 = scmp.lt.s32.totalorder %s779_s15, 3 }
   0x4   : > { %p168_p2 = pnand %p635_p0, %p167_p1 }
   0x5   : > { %p199_p3 = scmp.lt.s32.totalorder (!%p168_p2), %s631_s16, 1  ;;  %s854_s5 = smov (!%p168_p2), 0  }
   0x6   : > { %171 = sbr.rel (%p168_p2) target bundleno = 246 (0xf6), region = 28 }
   0xb   : > { %s934_s16 = smov (!%p199_p3, %s631_s16), 1  ;;  %v850_v0 = vmov 0.0   ;;  %v852_v1 = vmov 0.0  }
   0xc   : > { %s718_s17 = smul.u32 72, %s934_s16  ;;  %s673_s18 = sshll.u32 %s934_s16, 5 }
   0xd   : > { %s835_s21 = scalar_lea.vmem %s928_s2, %s673_s18  ;;  %s211_s24 = scalar_lea.vmem %s929_s3, %s934_s16 }
   0xe   : > { %s844_s27 = scalar_lea.vmem %s926_s0, %s718_s17  ;;  %s214_s30 = scalar_lea.vmem %s930_s4, %s934_s16 }
   0xf LB: >> { %v753_v2 = vld [vmem:[%s927_s1 + $0x18] sm:$0xff]   ;;  %v793_v3 = vmov 0.0   ;;  %v754_v4 = vld [vmem:[%s927_s1 + $0x8] sm:$0xff]   ;;  %v755_v5 = vld [vmem:[%s927_s1 + $0x10] sm:$0xff]   ;;  %vm794_vm0 = vmmov 0   ;;  %s639_s12 = sshll.u32 %s791_s5, 2  ;;  %s791_s5 = sphi %s854_s5, %s221_s5   ;;  %v787_v1 = vphi %v852_v1, %v932_v1   ;;  %v783_v0 = vphi %v850_v0, %v931_v0  }
  0x10   : >> { %686 = vmatprep.subr.bf16.mxu0 %v793_v3  ;;  %694 = vmatprep.subr.bf16.mxu1 %v793_v3  ;;  %v756_v6 = vld [vmem:[%s927_s1] sm:$0xff]   ;;  %s225_s17 = scalar_lea.vmem %s844_s27, %s639_s12  ;;  %vm252_vm1 = vcmask 261120   ;;  %v757_v9 = vld [vmem:[%s927_s1 + $0x28] sm:$0xff]   ;;  %v758_v10 = vld [vmem:[%s927_s1 + $0x38] sm:$0xff]   ;;  %s483_s29 = scalar_lea.vmem %s835_s21, %s639_s12 }
  0x11   : >> { %687 = vmatpush3.bf16.msra.mxu0 %v753_v2  ;;  %690 = vmatprep.mubr.msk.bf16.mxu0 %vm794_vm0, %v793_v3  ;;  %v641_v7 = vld [vmem:[%s225_s17 + $0x24] sm:$0xf]  ;;  %v226_v8 = vld [vmem:[%s225_s17] sm:$0xf]  ;;  %v760_v12 = vld [vmem:[%s927_s1 + $0x30] sm:$0xff]   ;;  %s221_s5 = sadd.s32 1, %s791_s5  }
  0x12   : >> { %695 = vmatpush3.bf16.msra.mxu1 %v754_v4  ;;  %688 = vmatprep.subr.bf16.mxu0 %v793_v3  ;;  %v759_v11 = vld [vmem:[%s927_s1 + $0x20] sm:$0xff]   ;;  %v662_v14 = vld [vmem:[%s225_s17 + $0x28] sm:$0xf]  ;;  %p218_p4 = scmp.ge.s32.totalorder %s221_s5, 8  }
  0x13   : >> { %696 = vmatprep.subr.bf16.mxu1 %v793_v3  ;;  %698 = vmatprep.mubr.msk.bf16.mxu1 %vm794_vm0, %v793_v3  ;;  %v653_v13 = vld [vmem:[%s225_s17 + $0x4] sm:$0xf] }
  0x15   : >> { %689 = vmatpush3.bf16.msra.mxu0 %v755_v5 }
  0x16   : >> { %697 = vmatpush3.bf16.msra.mxu1 %v756_v6  ;;  %702 = vmatprep.subr.bf16.mxu0 %v793_v3 }
  0x17   : >> { %710 = vmatprep.subr.bf16.mxu1 %v793_v3 }
  0x18   : >> { %691 = vmatmul.mubr.msk.bf16.vlgmr.msra.gmra.mxu0 %vm252_vm1, %v641_v7 }
  0x19   : >> { %699 = vmatmul.mubr.msk.bf16.vlgmr.msra.gmra.mxu1 %vm252_vm1, %v226_v8  ;;  %703 = vmatpush3.bf16.msra.mxu0 %v757_v9 }
  0x1a   : >> { %711 = vmatpush3.bf16.msra.mxu1 %v758_v10  ;;  %704 = vmatprep.subr.bf16.mxu0 %v793_v3 }
  0x1b   : >> { %712 = vmatprep.subr.bf16.mxu1 %v793_v3  ;;  %706 = vmatprep.mubr.msk.bf16.mxu0 %vm794_vm0, %v793_v3 }
  0x1c   : >> { %714 = vmatprep.mubr.msk.bf16.mxu1 %vm794_vm0, %v793_v3 }
  0x1d   : >> { %705 = vmatpush3.bf16.msra.mxu0 %v759_v11 }
  0x1e   : >> { %713 = vmatpush3.bf16.msra.mxu1 %v760_v12 }
  0x20   : >> { %707 = vmatmul.mubr.msk.bf16.vlgmr.msra.gmra.mxu0 %vm252_vm1, %v653_v13 }
  0x21   : >> { %715 = vmatmul.mubr.msk.bf16.vlgmr.msra.gmra.mxu1 %vm252_vm1, %v662_v14 }
  0xd8   : >> { %v290_v15 = vpop.f32.mrf.mxu0 }
  0xd9   : >> { %v345_v16 = vpop.f32.mrf.mxu1 }
  0xda   : >> { %v692_v17 = vpop.f32.mrf.mxu0  ;;  %v346_v22 = vadd.f32 %v345_v16, %v290_v15 }
  0xdb   : >> { %v700_v18 = vpop.f32.mrf.mxu1 }
  0xdc   : >> { %v293_v19 = vpop.f32.mrf.mxu0 }
  0xdd   : >> { %v348_v20 = vpop.f32.mrf.mxu1 }
  0xde   : >> { %v693_v21 = vpop.f32.mrf.mxu0 }
  0xdf   : >> { %v701_v23 = vpop.f32.mrf.mxu1 }
  0xe0   : >> { %v409_v24 = vpop.f32.mrf.mxu0 }
  0xe1   : >> { %v415_v25 = vadd.f32 %v409_v24, %v346_v22  ;;  %v474_v26 = vpop.f32.mrf.mxu1 }
  0xe2   : >> { %v708_v27 = vpop.f32.mrf.mxu0 }
  0xe3   : >> { %v480_v28 = vadd.f32 %v474_v26, %v415_v25  ;;  %v716_v29 = vpop.f32.mrf.mxu1 }
  0xe4   : >> { %v412_v30 = vpop.f32.mrf.mxu0 }
  0xe5   : >> { %v481_v31 = vpack.c.bf16 %v480_v28, %v480_v28  ;;  %v485_v32 = vrot.slane %v480_v28, 4  ;;  %v492_v33 = vmul.f32 %v480_v28, %v480_v28  ;;  %v477_v34 = vpop.f32.mrf.mxu1 }
  0xe6   : >> { %v709_v35 = vpop.f32.mrf.mxu0 }
  0xe7   : >> { %484 = vst [vmem:[%s483_s29] sm:$0xf] %v481_v31  ;;  %v486_v36 = vadd.f32 %v485_v32, %v480_v28  ;;  %v493_v37 = vrot.slane %v492_v33, 4  ;;  %v717_v38 = vpop.f32.mrf.mxu1 }
  0xe9   : >> { %v487_v39 = vrot.slane %v486_v36, 2  ;;  %v494_v40 = vadd.f32 %v493_v37, %v492_v33 }
  0xeb   : >> { %v488_v41 = vadd.f32 %v487_v39, %v486_v36  ;;  %v495_v42 = vrot.slane %v494_v40, 2 }
  0xed   : >> { %v489_v43 = vrot.slane %v488_v41, 1  ;;  %v496_v44 = vadd.f32 %v495_v42, %v494_v40 }
  0xef   : >> { %v490_v45 = vadd.f32 %v489_v43, %v488_v41  ;;  %v497_v46 = vrot.slane %v496_v44, 1 }
  0xf1   : >> { %v491_v47 = vadd.f32 %v787_v1, %v490_v45   ;;  %v498_v48 = vadd.f32 %v497_v46, %v496_v44  ;;  %220 = sbr.rel (!%p218_p4) target bundleno = 15 (0xf), region = 97 }
  0xf3   : >> { %v499_v49 = vadd.f32 %v783_v0, %v498_v48   ;;  %v932_v1 = vmov %v491_v47  ;;  %500 = vst [vmem:[%s211_s24] sm:$0x1] (%p218_p4), %v491_v47 }
  0xf5   : >> { %v931_v0 = vmov %v499_v49  ;;  %501 = vst [vmem:[%s214_s30] sm:$0x1] (%p218_p4), %v499_v49 }
  0xf6 PF: > { %s15_s15 = sadd.s32 1, %s779_s15  }
  0xf7   : > { %p12_p5 = scmp.ge.s32.totalorder %s15_s15, 4  }
  0xf9   :  { %14 = sbr.rel (!%p12_p5) target bundleno = 1 (0x1), region = 108 }

// kernel: d_patchgan_forward.9
= control target key start
LH: loop header
LB: loop body
LE: loop exit
PB: predicated region body
PF: predicated region fallthrough
CT: control target
= control target key end

     0   :  { %s405_s12 = smov 0   ;;  %s435_s0 = inlined_call_operand.vmem [shape: bf16[2,8,8,128], index: 0, kind: input, shape index: {}]   ;;  %s436_s1 = inlined_call_operand.vmem [shape: f32[1,128], index: 1, kind: input, shape index: {}]   ;;  %s437_s2 = inlined_call_operand.vmem [shape: f32[1,128], index: 2, kind: input, shape index: {}]   ;;  %s438_s3 = inlined_call_operand.vmem [shape: bf16[2,8,8,128], index: 3, kind: output, shape index: {}]  }
   0x1 LB: > { %s312_s13 = sadd.s32 4294967295, %s383_s12   ;;  %p316_p0 = scmp.ge.s32.totalorder %s383_s12, 1  ;;  %s383_s12 = sphi %s405_s12, %s13_s12  }
   0x2   : > { %p137_p1 = scmp.lt.s32.totalorder %s383_s12, 3 }
   0x4   : > { %p138_p2 = pnand %p316_p0, %p137_p1 }
   0x5   : > { %p161_p3 = scmp.lt.s32.totalorder (!%p138_p2), %s312_s13, 1 }
   0x6   : > { %141 = sbr.rel (%p138_p2) target bundleno = 32 (0x20), region = 32 }
   0xb   : > { %s440_s13 = smov (!%p161_p3, %s312_s13), 1  ;;  %v321_v0 = vld [vmem:[%s436_s1] ss:$0 sm:$0xff] }
   0xc   : > { %s325_s14 = sshll.u32 %s440_s13, 5  ;;  %v322_v13 = vld [vmem:[%s437_s2] ss:$0 sm:$0xff] }
   0xd   : > { %s165_s17 = scalar_lea.vmem %s435_s0, %s325_s14  ;;  %s170_s24 = scalar_lea.vmem %s438_s3, %s325_s14 }
   0xe   : > { %v328_v1 = vld [vmem:[%s165_s17] sm:$0xff]   ;;  %v363_v2 = vld [vmem:[%s165_s17 + $0x8] sm:$0xff]   ;;  %v364_v3 = vld [vmem:[%s165_s17 + $0x10] sm:$0xff]  }
   0xf   : > { %v329_v4 = vunpack.c.l.bf16 %v328_v1  ;;  %v330_v5 = vunpack.c.h.bf16 %v328_v1  ;;  %v333_v6 = vunpack.c.l.bf16 %v363_v2  ;;  %v334_v7 = vunpack.c.h.bf16 %v363_v2  ;;  %v365_v8 = vld [vmem:[%s165_s17 + $0x18] sm:$0xff]  }
  0x10   : > { %v337_v9 = vunpack.c.l.bf16 %v364_v3  ;;  %v338_v10 = vunpack.c.h.bf16 %v364_v3  ;;  %v341_v11 = vunpack.c.l.bf16 %v365_v8  ;;  %v342_v12 = vunpack.c.h.bf16 %v365_v8 }
  0x11   : > { %v194_v14 = vmul.f32 %v329_v4, %v321_v0  ;;  %v195_v15 = vmul.f32 %v330_v5, %v321_v0  ;;  %v196_v16 = vmul.f32 %v333_v6, %v321_v0  ;;  %v197_v17 = vmul.f32 %v334_v7, %v321_v0 }
  0x12   : > { %v198_v18 = vmul.f32 %v337_v9, %v321_v0  ;;  %v199_v19 = vmul.f32 %v338_v10, %v321_v0  ;;  %v200_v20 = vmul.f32 %v341_v11, %v321_v0  ;;  %v201_v21 = vmul.f32 %v342_v12, %v321_v0 }
  0x13   : > { %v209_v22 = vadd.f32 %v322_v13, %v194_v14  ;;  %v210_v23 = vadd.f32 %v322_v13, %v195_v15  ;;  %v211_v24 = vadd.f32 %v322_v13, %v196_v16  ;;  %v212_v25 = vadd.f32 %v322_v13, %v197_v17 }
  0x14   : > { %v213_v26 = vadd.f32 %v322_v13, %v198_v18  ;;  %v214_v27 = vadd.f32 %v322_v13, %v199_v19  ;;  %v215_v28 = vadd.f32 %v322_v13, %v200_v20  ;;  %v216_v29 = vadd.f32 %v322_v13, %v201_v21 }
  0x15   : > { %vm217_vm0 = vcmp.gt.f32.partialorder %v209_v22, 0.0  ;;  %vm218_vm1 = vcmp.gt.f32.partialorder %v210_v23, 0.0  ;;  %v225_v30 = vmul.f32 0.2, %v209_v22  ;;  %v226_v31 = vmul.f32 0.2, %v210_v23 }
  0x16   : > { %vm219_vm2 = vcmp.gt.f32.partialorder %v211_v24, 0.0  ;;  %vm220_vm3 = vcmp.gt.f32.partialorder %v212_v25, 0.0  ;;  %v227_v32 = vmul.f32 0.2, %v211_v24  ;;  %v228_v33 = vmul.f32 0.2, %v212_v25 }
  0x17   : > { %v233_v34 = vsel %vm217_vm0, %v209_v22, %v225_v30  ;;  %v234_v35 = vsel %vm218_vm1, %v210_v23, %v226_v31  ;;  %vm221_vm4 = vcmp.gt.f32.partialorder %v213_v26, 0.0  ;;  %vm222_vm5 = vcmp.gt.f32.partialorder %v214_v27, 0.0 }
  0x18   : > { %v346_v36 = vpack.c.bf16 %v234_v35, %v233_v34  ;;  %v235_v37 = vsel %vm219_vm2, %v211_v24, %v227_v32  ;;  %v236_v38 = vsel %vm220_vm3, %v212_v25, %v228_v33  ;;  %v229_v39 = vmul.f32 0.2, %v213_v26 }
  0x19   : > { %v351_v40 = vpack.c.bf16 %v236_v38, %v235_v37  ;;  %v230_v41 = vmul.f32 0.2, %v214_v27  ;;  %vm223_vm6 = vcmp.gt.f32.partialorder %v215_v28, 0.0  ;;  %vm224_vm7 = vcmp.gt.f32.partialorder %v216_v29, 0.0 }
  0x1a   : > { %347 = vst [vmem:[%s170_s24] sm:$0xff] %v346_v36   ;;  %v237_v42 = vsel %vm221_vm4, %v213_v26, %v229_v39  ;;  %v231_v43 = vmul.f32 0.2, %v215_v28  ;;  %v232_v44 = vmul.f32 0.2, %v216_v29 }
  0x1b   : > { %366 = vst [vmem:[%s170_s24 + $0x8] sm:$0xff] %v351_v40   ;;  %v238_v45 = vsel %vm222_vm5, %v214_v27, %v230_v41 }
  0x1c   : > { %v356_v46 = vpack.c.bf16 %v238_v45, %v237_v42  ;;  %v239_v47 = vsel %vm223_vm6, %v215_v28, %v231_v43  ;;  %v240_v48 = vsel %vm224_vm7, %v216_v29, %v232_v44 }
  0x1d   : > { %v361_v49 = vpack.c.bf16 %v240_v48, %v239_v47 }
  0x1e   : > { %367 = vst [vmem:[%s170_s24 + $0x10] sm:$0xff] %v356_v46  }
  0x1f   : > { %368 = vst [vmem:[%s170_s24 + $0x18] sm:$0xff] %v361_v49  }
  0x20 PF: > { %s13_s12 = sadd.s32 1, %s383_s12  }
  0x21   : > { %p10_p4 = scmp.ge.s32.totalorder %s13_s12, 4  }
  0x23   :  { %12 = sbr.rel (!%p10_p4) target bundleno = 1 (0x1), region = 62 }

// kernel: d_patchgan_forward.10
= control target key start
LH: loop header
LB: loop body
LE: loop exit
PB: predicated region body
PF: predicated region fallthrough
CT: control target
= control target key end

     0   :  { %s939_s15 = smov 0   ;;  %s1075_s0 = inlined_call_operand.vmem [shape: bf16[2,10,4,64], index: 0, kind: input, shape index: {}]   ;;  %s1076_s1 = inlined_call_operand.vmem [shape: bf16[4,64,128], index: 1, kind: input, shape index: {}]   ;;  %s1077_s2 = inlined_call_operand.vmem [shape: bf16[2,4,4,128], index: 2, kind: output, shape index: {0}]   ;;  %s1078_s3 = inlined_call_operand.vmem [shape: f32[2,1,128], index: 3, kind: output, shape index: {1}]   ;;  %s1079_s4 = inlined_call_operand.vmem [shape: f32[2,1,128], index: 4, kind: output, shape index: {2}]  }
   0x1 LB: > { %s698_s16 = sadd.s32 4294967295, %s898_s15   ;;  %p702_p0 = scmp.ge.s32.totalorder %s898_s15, 1  ;;  %s898_s15 = sphi %s939_s15, %s15_s15  }
   0x2   : > { %p167_p1 = scmp.lt.s32.totalorder %s898_s15, 3 }
   0x4   : > { %p168_p2 = pnand %p702_p0, %p167_p1 }
   0x5   : > { %p199_p3 = scmp.lt.s32.totalorder (!%p168_p2), %s698_s16, 1  ;;  %s973_s5 = smov (!%p168_p2), 0  }
   0x6   : > { %171 = sbr.rel (%p168_p2) target bundleno = 263 (0x107), region = 28 }
   0xb   : > { %s1083_s16 = smov (!%p199_p3, %s698_s16), 1  ;;  %v969_v0 = vmov 0.0   ;;  %v971_v1 = vmov 0.0  }
   0xc   : > { %s829_s17 = smul.u32 20, %s1083_s16  ;;  %s760_s18 = sshll.u32 %s1083_s16, 3 }
   0xd   : > { %s954_s21 = scalar_lea.vmem %s1077_s2, %s760_s18  ;;  %s211_s24 = scalar_lea.vmem %s1078_s3, %s1083_s16 }
   0xe   : > { %s963_s27 = scalar_lea.vmem %s1075_s0, %s829_s17  ;;  %s214_s30 = scalar_lea.vmem %s1079_s4, %s1083_s16 }
   0xf LB: >> { %v864_v2 = vld [vmem:[%s1076_s1 + $0x38] sm:$0xff]   ;;  %v912_v3 = vmov 0.0   ;;  %v866_v5 = vld [vmem:[%s1076_s1 + $0x30] sm:$0xff]   ;;  %vm913_vm0 = vmmov 0   ;;  %v868_v7 = vld [vmem:[%s1076_s1 + $0x28] sm:$0xff]   ;;  %s706_s18 = sshll.u32 %s910_s5, 1  ;;  %s910_s5 = sphi %s973_s5, %s221_s5   ;;  %v906_v1 = vphi %v971_v1, %v1081_v1   ;;  %v902_v0 = vphi %v969_v0, %v1080_v0  }
  0x10   : >> { %781 = vmatprep.subr.bf16.mxu0 %v912_v3  ;;  %793 = vmatprep.subr.bf16.mxu1 %v912_v3  ;;  %v865_v4 = vld [vmem:[%s1076_s1 + $0x18] sm:$0xff]   ;;  %v867_v6 = vld [vmem:[%s1076_s1 + $0x10] sm:$0xff]   ;;  %v869_v8 = vld [vmem:[%s1076_s1 + $0x8] sm:$0xff]   ;;  %s1008_s22 = scalar_lea.vmem %s963_s27, %s706_s18  ;;  %vm272_vm1 = vcmask 523264   ;;  %vm549_vm2 = vcmask 1043456   ;;  %s221_s5 = sadd.s32 1, %s910_s5  }
  0x11   : >> { %782 = vmatpush3.bf16.msra.mxu0 %v864_v2  ;;  %789 = vmatprep.mubr.msk.bf16.mxu0 %vm913_vm0, %v912_v3  ;;  %v870_v9 = vld [vmem:[%s1076_s1 + $0x20] sm:$0xff]   ;;  %v708_v11 = vld [vmem:[%s1008_s22 + $0xa] sm:$0x3]  ;;  %v872_v13 = vld [vmem:[%s1076_s1 + $0x58] sm:$0xff]   ;;  %p218_p4 = scmp.ge.s32.totalorder %s221_s5, 4  }
  0x12   : >> { %794 = vmatpush3.bf16.msra.mxu1 %v865_v4  ;;  %783 = vmatprep.subr.bf16.mxu0 %v912_v3  ;;  %v871_v10 = vld [vmem:[%s1076_s1] sm:$0xff]   ;;  %v873_v14 = vld [vmem:[%s1076_s1 + $0x78] sm:$0xff]   ;;  %v874_v15 = vld [vmem:[%s1076_s1 + $0x50] sm:$0xff]  }
  0x13   : >> { %795 = vmatprep.subr.bf16.mxu1 %v912_v3  ;;  %801 = vmatprep.mubr.msk.bf16.mxu1 %vm913_vm0, %v912_v3  ;;  %v226_v12 = vld [vmem:[%s1008_s22] sm:$0x3]  ;;  %v875_v16 = vld [vmem:[%s1076_s1 + $0x70] sm:$0xff]   ;;  %v876_v17 = vld [vmem:[%s1076_s1 + $0x48] sm:$0xff]  }
  0x14   : >> { %v877_v18 = vld [vmem:[%s1076_s1 + $0x68] sm:$0xff]   ;;  %v878_v19 = vld [vmem:[%s1076_s1 + $0x40] sm:$0xff]  }
  0x15   : >> { %784 = vmatpush3.bf16.msra.mxu0 %v866_v5  ;;  %v879_v20 = vld [vmem:[%s1076_s1 + $0x60] sm:$0xff]   ;;  %v743_v22 = vld [vmem:[%s1008_s22 + $0xc] sm:$0x3] }
  0x16   : >> { %796 = vmatpush3.bf16.msra.mxu1 %v867_v6  ;;  %785 = vmatprep.subr.bf16.mxu0 %v912_v3  ;;  %v728_v21 = vld [vmem:[%s1008_s22 + $0x2] sm:$0x3]  ;;  %s547_s22 = scalar_lea.vmem %s954_s21, %s706_s18 }
  0x17   : >> { %797 = vmatprep.subr.bf16.mxu1 %v912_v3 }
  0x19   : >> { %786 = vmatpush3.bf16.msra.mxu0 %v868_v7 }
  0x1a   : >> { %798 = vmatpush3.bf16.msra.mxu1 %v869_v8  ;;  %787 = vmatprep.subr.bf16.mxu0 %v912_v3 }
  0x1b   : >> { %799 = vmatprep.subr.bf16.mxu1 %v912_v3 }
  0x1d   : >> { %788 = vmatpush3.bf16.msra.mxu0 %v870_v9 }
  0x1e   : >> { %800 = vmatpush3.bf16.msra.mxu1 %v871_v10  ;;  %805 = vmatprep.subr.bf16.mxu0 %v912_v3 }
  0x1f   : >> { %817 = vmatprep.subr.bf16.mxu1 %v912_v3 }
  0x20   : >> { %790 = vmatmul.mubr.msk.bf16.vlgmr.msra.gmra.mxu0 %vm272_vm1, %v708_v11 }
  0x21   : >> { %802 = vmatmul.mubr.msk.bf16.vlgmr.msra.gmra.mxu1 %vm272_vm1, %v226_v12  ;;  %806 = vmatpush3.bf16.msra.mxu0 %v872_v13 }
  0x22   : >> { %818 = vmatpush3.bf16.msra.mxu1 %v873_v14  ;;  %807 = vmatprep.subr.bf16.mxu0 %v912_v3 }
  0x23   : >> { %819 = vmatprep.subr.bf16.mxu1 %v912_v3  ;;  %813 = vmatprep.mubr.msk.bf16.mxu0 %vm913_vm0, %v912_v3 }
  0x24   : >> { %825 = vmatprep.mubr.msk.bf16.mxu1 %vm913_vm0, %v912_v3 }
  0x25   : >> { %808 = vmatpush3.bf16.msra.mxu0 %v874_v15 }
  0x26   : >> { %820 = vmatpush3.bf16.msra.mxu1 %v875_v16  ;;  %809 = vmatprep.subr.bf16.mxu0 %v912_v3 }
  0x27   : >> { %821 = vmatprep.subr.bf16.mxu1 %v912_v3 }
  0x29   : >> { %810 = vmatpush3.bf16.msra.mxu0 %v876_v17 }
  0x2a   : >> { %822 = vmatpush3.bf16.msra.mxu1 %v877_v18  ;;  %811 = vmatprep.subr.bf16.mxu0 %v912_v3 }
  0x2b   : >> { %823 = vmatprep.subr.bf16.mxu1 %v912_v3 }
  0x2d   : >> { %812 = vmatpush3.bf16.msra.mxu0 %v878_v19 }
  0x2e   : >> { %824 = vmatpush3.bf16.msra.mxu1 %v879_v20 }
  0x30   : >> { %814 = vmatmul.mubr.msk.bf16.vlgmr.msra.gmra.mxu0 %vm272_vm1, %v728_v21 }
  0x31   : >> { %826 = vmatmul.mubr.msk.bf16.vlgmr.msra.gmra.mxu1 %vm272_vm1, %v743_v22 }
  0xe0   : >> { %v310_v23 = vpop.f32.mrf.mxu0 }
  0xe1   : >> { %v377_v24 = vpop.f32.mrf.mxu1 }
  0xe2   : >> { %v791_v25 = vpop.f32.mrf.mxu0  ;;  %v378_v31 = vadd.f32 %v377_v24, %v310_v23 }
  0xe3   : >> { %v803_v26 = vpop.f32.mrf.mxu1 }
  0xe4   : >> { %v313_v27 = vpop.f32.mrf.mxu0 }
  0xe5   : >> { %v380_v28 = vpop.f32.mrf.mxu1 }
  0xe6   : >> { %v792_v29 = vpop.f32.mrf.mxu0 }
  0xe7   : >> { %v804_v30 = vpop.f32.mrf.mxu1 }
  0xf0   : >> { %v457_v32 = vpop.f32.mrf.mxu0 }
  0xf1   : >> { %v463_v33 = vadd.f32 %v457_v32, %v378_v31  ;;  %v538_v34 = vpop.f32.mrf.mxu1 }
  0xf2   : >> { %v815_v35 = vpop.f32.mrf.mxu0 }
  0xf3   : >> { %v544_v36 = vadd.f32 %v538_v34, %v463_v33  ;;  %v827_v37 = vpop.f32.mrf.mxu1 }
  0xf4   : >> { %v460_v38 = vpop.f32.mrf.mxu0 }
  0xf5   : >> { %v545_v39 = vpack.c.bf16 %v544_v36, %v544_v36  ;;  %v550_v40 = vsel %vm549_vm2, %v544_v36, 0.0  ;;  %v558_v41 = vmul.f32 %v544_v36, %v544_v36  ;;  %v541_v42 = vpop.f32.mrf.mxu1 }
  0xf6   : >> { %v551_v43 = vrot.slane %v550_v40, 4  ;;  %v816_v44 = vpop.f32.mrf.mxu0 }
  0xf7   : >> { %548 = vst [vmem:[%s547_s22] sm:$0x3] %v545_v39  ;;  %v559_v45 = vsel %vm549_vm2, %v558_v41, 0.0  ;;  %v828_v46 = vpop.f32.mrf.mxu1 }
  0xf8   : >> { %v552_v47 = vadd.f32 %v551_v43, %v550_v40  ;;  %v560_v48 = vrot.slane %v559_v45, 4 }
  0xfa   : >> { %v553_v49 = vrot.slane %v552_v47, 2  ;;  %v561_v50 = vadd.f32 %v560_v48, %v559_v45 }
  0xfc   : >> { %v554_v51 = vadd.f32 %v553_v49, %v552_v47  ;;  %v562_v52 = vrot.slane %v561_v50, 2 }
  0xfe   : >> { %v555_v53 = vrot.slane %v554_v51, 1  ;;  %v563_v54 = vadd.f32 %v562_v52, %v561_v50 }
 0x100   : >> { %v556_v55 = vadd.f32 %v555_v53, %v554_v51  ;;  %v564_v56 = vrot.slane %v563_v54, 1 }
 0x102   : >> { %v557_v57 = vadd.f32 %v906_v1, %v556_v55   ;;  %v565_v58 = vadd.f32 %v564_v56, %v563_v54  ;;  %220 = sbr.rel (!%p218_p4) target bundleno = 15 (0xf), region = 97 }
 0x104   : >> { %v566_v59 = vadd.f32 %v902_v0, %v565_v58   ;;  %v1081_v1 = vmov %v557_v57  ;;  %567 = vst [vmem:[%s211_s24] sm:$0x1] (%p218_p4), %v557_v57 }
 0x106   : >> { %v1080_v0 = vmov %v566_v59  ;;  %568 = vst [vmem:[%s214_s30] sm:$0x1] (%p218_p4), %v566_v59 }
 0x107 PF: > { %s15_s15 = sadd.s32 1, %s898_s15  }
 0x108   : > { %p12_p5 = scmp.ge.s32.totalorder %s15_s15, 4  }
 0x10a   :  { %14 = sbr.rel (!%p12_p5) target bundleno = 1 (0x1), region = 108 }

// kernel: d_patchgan_forward.11
= control target key start
LH: loop header
LB: loop body
LE: loop exit
PB: predicated region body
PF: predicated region fallthrough
CT: control target
= control target key end

     0   :  { %s327_s12 = smov 0   ;;  %s353_s0 = inlined_call_operand.vmem [shape: bf16[2,4,4,128], index: 0, kind: input, shape index: {}]   ;;  %s354_s1 = inlined_call_operand.vmem [shape: f32[1,128], index: 1, kind: input, shape index: {}]   ;;  %s355_s2 = inlined_call_operand.vmem [shape: f32[1,128], index: 2, kind: input, shape index: {}]   ;;  %s356_s3 = inlined_call_operand.vmem [shape: bf16[2,4,4,128], index: 3, kind: output, shape index: {}]  }
   0x1 LB: > { %s276_s13 = sadd.s32 4294967295, %s305_s12   ;;  %p280_p0 = scmp.ge.s32.totalorder %s305_s12, 1  ;;  %s305_s12 = sphi %s327_s12, %s13_s12  }
   0x2   : > { %p137_p1 = scmp.lt.s32.totalorder %s305_s12, 3 }
   0x4   : > { %p138_p2 = pnand %p280_p0, %p137_p1 }
   0x5   : > { %p161_p3 = scmp.lt.s32.totalorder (!%p138_p2), %s276_s13, 1 }
   0x6   : > { %141 = sbr.rel (%p138_p2) target bundleno = 28 (0x1c), region = 32 }
   0xb   : > { %s358_s13 = smov (!%p161_p3, %s276_s13), 1  ;;  %v285_v0 = vld [vmem:[%s354_s1] ss:$0 sm:$0xff] }
   0xc   : > { %s289_s14 = sshll.u32 %s358_s13, 3  ;;  %v286_v9 = vld [vmem:[%s355_s2] ss:$0 sm:$0xff] }
   0xd   : > { %s165_s17 = scalar_lea.vmem %s353_s0, %s289_s14  ;;  %s170_s24 = scalar_lea.vmem %s356_s3, %s289_s14 }
   0xe   : > { %v171_v1 = vld [vmem:[%s165_s17] sm:$0x3]  ;;  %v172_v2 = vld [vmem:[%s165_s17 + $0x2] sm:$0x3]  ;;  %v173_v3 = vld [vmem:[%s165_s17 + $0x4] sm:$0x3] }
   0xf   : > { %v174_v4 = vld [vmem:[%s165_s17 + $0x6] sm:$0x3]  ;;  %v175_v5 = vunpack.c.l.bf16 %v171_v1  ;;  %v176_v6 = vunpack.c.l.bf16 %v172_v2  ;;  %v177_v7 = vunpack.c.l.bf16 %v173_v3 }
  0x10   : > { %v178_v8 = vunpack.c.l.bf16 %v174_v4 }
  0x11   : > { %v186_v10 = vmul.f32 %v285_v0, %v175_v5  ;;  %v187_v11 = vmul.f32 %v285_v0, %v176_v6  ;;  %v188_v12 = vmul.f32 %v285_v0, %v177_v7 }
  0x12   : > { %v189_v13 = vmul.f32 %v285_v0, %v178_v8 }
  0x13   : > { %v197_v14 = vadd.f32 %v286_v9, %v186_v10  ;;  %v198_v15 = vadd.f32 %v286_v9, %v187_v11  ;;  %v199_v16 = vadd.f32 %v286_v9, %v188_v12 }
  0x14   : > { %v200_v17 = vadd.f32 %v286_v9, %v189_v13 }
  0x15   : > { %vm201_vm0 = vcmp.gt.f32.partialorder %v197_v14, 0.0  ;;  %v205_v18 = vmul.f32 0.2, %v197_v14  ;;  %vm202_vm1 = vcmp.gt.f32.partialorder %v198_v15, 0.0  ;;  %v206_v19 = vmul.f32 0.2, %v198_v15 }
  0x16   : > { %vm203_vm2 = vcmp.gt.f32.partialorder %v199_v16, 0.0  ;;  %v207_v20 = vmul.f32 0.2, %v199_v16  ;;  %vm204_vm3 = vcmp.gt.f32.partialorder %v200_v17, 0.0  ;;  %v208_v21 = vmul.f32 0.2, %v200_v17 }
  0x17   : > { %v209_v22 = vsel %vm201_vm0, %v197_v14, %v205_v18  ;;  %v210_v23 = vsel %vm202_vm1, %v198_v15, %v206_v19 }
  0x18   : > { %v213_v24 = vpack.c.bf16 %v209_v22, %v209_v22  ;;  %v214_v25 = vpack.c.bf16 %v210_v23, %v210_v23  ;;  %v211_v26 = vsel %vm203_vm2, %v199_v16, %v207_v20  ;;  %v212_v27 = vsel %vm204_vm3, %v200_v17, %v208_v21 }
  0x19   : > { %v215_v28 = vpack.c.bf16 %v211_v26, %v211_v26  ;;  %v216_v29 = vpack.c.bf16 %v212_v27, %v212_v27 }
  0x1a   : > { %217 = vst [vmem:[%s170_s24] sm:$0x3] %v213_v24  ;;  %218 = vst [vmem:[%s170_s24 + $0x2] sm:$0x3] %v214_v25 }
  0x1b   : > { %219 = vst [vmem:[%s170_s24 + $0x4] sm:$0x3] %v215_v28  ;;  %220 = vst [vmem:[%s170_s24 + $0x6] sm:$0x3] %v216_v29 }
  0x1c PF: > { %s13_s12 = sadd.s32 1, %s305_s12  }
  0x1d   : > { %p10_p4 = scmp.ge.s32.totalorder %s13_s12, 4  }
  0x1f   :  { %12 = sbr.rel (!%p10_p4) target bundleno = 1 (0x1), region = 62 }

// kernel: d_patchgan_forward.13
= control target key start
LH: loop header
LB: loop body
LE: loop exit
PB: predicated region body
PF: predicated region fallthrough
CT: control target
= control target key end

     0   :  { %s302_s12 = smov 0   ;;  %s325_s0 = inlined_call_operand.vmem [shape: bf16[2,2,2,128], index: 0, kind: input, shape index: {}]   ;;  %s326_s1 = inlined_call_operand.vmem [shape: f32[1,128], index: 1, kind: input, shape index: {}]   ;;  %s327_s2 = inlined_call_operand.vmem [shape: f32[1,128], index: 2, kind: input, shape index: {}]   ;;  %s328_s3 = inlined_call_operand.vmem [shape: f32[2,2,2,128], index: 3, kind: output, shape index: {}]  }
   0x1 LB: > { %s253_s13 = sadd.s32 4294967295, %s280_s12   ;;  %p257_p0 = scmp.ge.s32.totalorder %s280_s12, 1  ;;  %s280_s12 = sphi %s302_s12, %s13_s12  }
   0x2   : > { %p136_p1 = scmp.lt.s32.totalorder %s280_s12, 3 }
   0x4   : > { %p137_p2 = pnand %p257_p0, %p136_p1 }
   0x5   : > { %p159_p3 = scmp.lt.s32.totalorder (!%p137_p2), %s253_s13, 1 }
   0x6   : > { %140 = sbr.rel (%p137_p2) target bundleno = 25 (0x19), region = 32 }
   0xb   : > { %s330_s13 = smov (!%p159_p3, %s253_s13), 1  ;;  %v261_v2 = vld [vmem:[%s326_s1] ss:$0 sm:$0xff] }
   0xc   : > { %s258_s14 = sshll.u32 %s330_s13, 1  ;;  %v262_v5 = vld [vmem:[%s327_s2] ss:$0 sm:$0xff]  ;;  %s265_s22 = sshll.u32 %s330_s13, 2 }
   0xd   : > { %s162_s17 = scalar_lea.vmem %s325_s0, %s258_s14  ;;  %s167_s25 = scalar_lea.vmem %s328_s3, %s265_s22 }
   0xe   : > { %v168_v0 = vld [vmem:[%s162_s17] sm:$0x1]  ;;  %v169_v1 = vld [vmem:[%s162_s17 + $0x1] sm:$0x1] }
   0xf   : > { %v170_v3 = vunpack.c.l.bf16 %v168_v0  ;;  %v171_v4 = vunpack.c.l.bf16 %v169_v1 }
  0x11   : > { %v179_v6 = vmul.f32 %v261_v2, %v170_v3  ;;  %v180_v7 = vmul.f32 %v261_v2, %v171_v4 }
  0x13   : > { %v188_v8 = vadd.f32 %v262_v5, %v179_v6  ;;  %v189_v9 = vadd.f32 %v262_v5, %v180_v7 }
  0x15   : > { %vm190_vm0 = vcmp.gt.f32.partialorder %v188_v8, 0.0  ;;  %v192_v10 = vmul.f32 0.2, %v188_v8  ;;  %vm191_vm1 = vcmp.gt.f32.partialorder %v189_v9, 0.0  ;;  %v193_v11 = vmul.f32 0.2, %v189_v9 }
  0x17   : > { %v194_v12 = vsel %vm190_vm0, %v188_v8, %v192_v10  ;;  %v195_v13 = vsel %vm191_vm1, %v189_v9, %v193_v11 }
  0x18   : > { %196 = vst [vmem:[%s167_s25] sm:$0x3] %v194_v12  ;;  %197 = vst [vmem:[%s167_s25 + $0x2] sm:$0x3] %v195_v13 }
  0x19 PF: > { %s13_s12 = sadd.s32 1, %s280_s12  }
  0x1a   : > { %p10_p4 = scmp.ge.s32.totalorder %s13_s12, 4  }
  0x1c   :  { %12 = sbr.rel (!%p10_p4) target bundleno = 1 (0x1), region = 62 }

// kernel: d_patchgan_forward.12
= control target key start
LH: loop header
LB: loop body
LE: loop exit
PB: predicated region body
PF: predicated region fallthrough
CT: control target
= control target key end

     0   :  { %s1129_s15 = smov 0   ;;  %s1342_s0 = inlined_call_operand.vmem [shape: bf16[2,6,2,128], index: 0, kind: input, shape index: {}]   ;;  %s1343_s1 = inlined_call_operand.vmem [shape: bf16[4,128,128], index: 1, kind: input, shape index: {}]   ;;  %s1344_s2 = inlined_call_operand.vmem [shape: bf16[2,2,2,128], index: 2, kind: output, shape index: {0}]   ;;  %s1345_s3 = inlined_call_operand.vmem [shape: f32[2,1,128], index: 3, kind: output, shape index: {1}]   ;;  %s1346_s4 = inlined_call_operand.vmem [shape: f32[2,1,128], index: 4, kind: output, shape index: {2}]  }
   0x1 LB: > { %s796_s16 = sadd.s32 4294967295, %s1088_s15   ;;  %p800_p0 = scmp.ge.s32.totalorder %s1088_s15, 1  ;;  %s1088_s15 = sphi %s1129_s15, %s15_s15  }
   0x2   : > { %p166_p1 = scmp.lt.s32.totalorder %s1088_s15, 3 }
   0x4   : > { %p167_p2 = pnand %p800_p0, %p166_p1 }
   0x5   : > { %p196_p3 = scmp.lt.s32.totalorder (!%p167_p2), %s796_s16, 1  ;;  %s1163_s5 = smov (!%p167_p2), 0  }
   0x6   : > { %170 = sbr.rel (%p167_p2) target bundleno = 295 (0x127), region = 28 }
   0xb   : > { %s1350_s16 = smov (!%p196_p3, %s796_s16), 1  ;;  %v1159_v0 = vmov 0.0   ;;  %v1161_v1 = vmov 0.0  }
   0xc   : > { %s1003_s17 = smul.u32 6, %s1350_s16  ;;  %s801_s18 = sshll.u32 %s1350_s16, 1 }
   0xd   : > { %s1144_s21 = scalar_lea.vmem %s1344_s2, %s801_s18  ;;  %s206_s24 = scalar_lea.vmem %s1345_s3, %s1350_s16 }
   0xe   : > { %s1153_s27 = scalar_lea.vmem %s1342_s0, %s1003_s17  ;;  %s209_s30 = scalar_lea.vmem %s1346_s4, %s1350_s16 }
   0xf LB: >> { %v1038_v2 = vld [vmem:[%s1343_s1 + $0x78] sm:$0xff]   ;;  %v1102_v3 = vmov 0.0   ;;  %v1040_v5 = vld [vmem:[%s1343_s1 + $0x70] sm:$0xff]   ;;  %vm1103_vm0 = vmmov 0   ;;  %v1042_v7 = vld [vmem:[%s1343_s1 + $0x68] sm:$0xff]   ;;  %s1236_s17 = scalar_lea.vmem %s1153_s27, %s1100_s5  ;;  %vm654_vm1 = vcmask 1041408   ;;  %s1100_s5 = sphi %s1163_s5, %s216_s5   ;;  %v1096_v1 = vphi %v1161_v1, %v1348_v1   ;;  %v1092_v0 = vphi %v1159_v0, %v1347_v0  }
  0x10   : >> { %923 = vmatprep.subr.bf16.mxu0 %v1102_v3  ;;  %943 = vmatprep.subr.bf16.mxu1 %v1102_v3  ;;  %v1039_v4 = vld [vmem:[%s1343_s1 + $0x38] sm:$0xff]   ;;  %v1041_v6 = vld [vmem:[%s1343_s1 + $0x30] sm:$0xff]   ;;  %v1043_v8 = vld [vmem:[%s1343_s1 + $0x28] sm:$0xff]  }
  0x11   : >> { %924 = vmatpush3.bf16.msra.mxu0 %v1038_v2  ;;  %939 = vmatprep.mubr.msk.bf16.mxu0 %vm1103_vm0, %v1102_v3  ;;  %v1044_v9 = vld [vmem:[%s1343_s1 + $0x60] sm:$0xff]   ;;  %v1046_v11 = vld [vmem:[%s1343_s1 + $0x58] sm:$0xff]   ;;  %v1048_v13 = vld [vmem:[%s1343_s1 + $0x50] sm:$0xff]  }
  0x12   : >> { %944 = vmatpush3.bf16.msra.mxu1 %v1039_v4  ;;  %925 = vmatprep.subr.bf16.mxu0 %v1102_v3  ;;  %v1045_v10 = vld [vmem:[%s1343_s1 + $0x20] sm:$0xff]   ;;  %v1047_v12 = vld [vmem:[%s1343_s1 + $0x18] sm:$0xff]   ;;  %v1049_v14 = vld [vmem:[%s1343_s1 + $0x10] sm:$0xff]  }
  0x13   : >> { %945 = vmatprep.subr.bf16.mxu1 %v1102_v3  ;;  %959 = vmatprep.mubr.msk.bf16.mxu1 %vm1103_vm0, %v1102_v3  ;;  %v1050_v15 = vld [vmem:[%s1343_s1 + $0x48] sm:$0xff]   ;;  %v1052_v17 = vld [vmem:[%s1343_s1 + $0x40] sm:$0xff]   ;;  %v1054_v21 = vld [vmem:[%s1343_s1 + $0xb8] sm:$0xff]  }
  0x14   : >> { %v1051_v16 = vld [vmem:[%s1343_s1 + $0x8] sm:$0xff]   ;;  %v1053_v18 = vld [vmem:[%s1343_s1] sm:$0xff]   ;;  %v1055_v22 = vld [vmem:[%s1343_s1 + $0xf8] sm:$0xff]  }
  0x15   : >> { %926 = vmatpush3.bf16.msra.mxu0 %v1040_v5  ;;  %v802_v19 = vld [vmem:[%s1236_s17 + $0x3] sm:$0x1]  ;;  %v220_v20 = vld [vmem:[%s1236_s17] sm:$0x1]  ;;  %v1056_v23 = vld [vmem:[%s1343_s1 + $0xb0] sm:$0xff]  }
  0x16   : >> { %946 = vmatpush3.bf16.msra.mxu1 %v1041_v6  ;;  %927 = vmatprep.subr.bf16.mxu0 %v1102_v3  ;;  %v1057_v24 = vld [vmem:[%s1343_s1 + $0xf0] sm:$0xff]   ;;  %v1058_v25 = vld [vmem:[%s1343_s1 + $0xa8] sm:$0xff]   ;;  %v1060_v27 = vld [vmem:[%s1343_s1 + $0xa0] sm:$0xff]  }
  0x17   : >> { %947 = vmatprep.subr.bf16.mxu1 %v1102_v3  ;;  %v1059_v26 = vld [vmem:[%s1343_s1 + $0xe8] sm:$0xff]   ;;  %v1061_v28 = vld [vmem:[%s1343_s1 + $0xe0] sm:$0xff]   ;;  %v1062_v29 = vld [vmem:[%s1343_s1 + $0x98] sm:$0xff]  }
  0x18   : >> { %v1063_v30 = vld [vmem:[%s1343_s1 + $0xd8] sm:$0xff]   ;;  %v1064_v31 = vld [vmem:[%s1343_s1 + $0x90] sm:$0xff]   ;;  %v1066_v33 = vld [vmem:[%s1343_s1 + $0x88] sm:$0xff]  }
  0x19   : >> { %928 = vmatpush3.bf16.msra.mxu0 %v1042_v7  ;;  %v1065_v32 = vld [vmem:[%s1343_s1 + $0xd0] sm:$0xff]   ;;  %v1067_v34 = vld [vmem:[%s1343_s1 + $0xc8] sm:$0xff]   ;;  %v1068_v35 = vld [vmem:[%s1343_s1 + $0x80] sm:$0xff]  }
  0x1a   : >> { %948 = vmatpush3.bf16.msra.mxu1 %v1043_v8  ;;  %929 = vmatprep.subr.bf16.mxu0 %v1102_v3  ;;  %v1069_v36 = vld [vmem:[%s1343_s1 + $0xc0] sm:$0xff]  }
  0x1b   : >> { %949 = vmatprep.subr.bf16.mxu1 %v1102_v3  ;;  %v835_v37 = vld [vmem:[%s1236_s17 + $0x1] sm:$0x1]  ;;  %v860_v38 = vld [vmem:[%s1236_s17 + $0x4] sm:$0x1]  ;;  %s652_s17 = scalar_lea.vmem %s1144_s21, %s1100_s5  ;;  %s216_s5 = sadd.s32 1, %s1100_s5  }
  0x1c   : >> { %p213_p4 = scmp.ge.s32.totalorder %s216_s5, 2  }
  0x1d   : >> { %930 = vmatpush3.bf16.msra.mxu0 %v1044_v9 }
  0x1e   : >> { %950 = vmatpush3.bf16.msra.mxu1 %v1045_v10  ;;  %931 = vmatprep.subr.bf16.mxu0 %v1102_v3 }
  0x1f   : >> { %951 = vmatprep.subr.bf16.mxu1 %v1102_v3 }
  0x21   : >> { %932 = vmatpush3.bf16.msra.mxu0 %v1046_v11 }
  0x22   : >> { %952 = vmatpush3.bf16.msra.mxu1 %v1047_v12  ;;  %933 = vmatprep.subr.bf16.mxu0 %v1102_v3 }
  0x23   : >> { %953 = vmatprep.subr.bf16.mxu1 %v1102_v3 }
  0x25   : >> { %934 = vmatpush3.bf16.msra.mxu0 %v1048_v13 }
  0x26   : >> { %954 = vmatpush3.bf16.msra.mxu1 %v1049_v14  ;;  %935 = vmatprep.subr.bf16.mxu0 %v1102_v3 }
  0x27   : >> { %955 = vmatprep.subr.bf16.mxu1 %v1102_v3 }
  0x29   : >> { %936 = vmatpush3.bf16.msra.mxu0 %v1050_v15 }
  0x2a   : >> { %956 = vmatpush3.bf16.msra.mxu1 %v1051_v16  ;;  %937 = vmatprep.subr.bf16.mxu0 %v1102_v3 }
  0x2b   : >> { %957 = vmatprep.subr.bf16.mxu1 %v1102_v3 }
  0x2d   : >> { %938 = vmatpush3.bf16.msra.mxu0 %v1052_v17 }
  0x2e   : >> { %958 = vmatpush3.bf16.msra.mxu1 %v1053_v18  ;;  %963 = vmatprep.subr.bf16.mxu0 %v1102_v3 }
  0x2f   : >> { %983 = vmatprep.subr.bf16.mxu1 %v1102_v3 }
  0x30   : >> { %940 = vmatmul.mubr.bf16.vlgmr.msra.gmra.mxu0 %v802_v19 }
  0x31   : >> { %960 = vmatmul.mubr.bf16.vlgmr.msra.gmra.mxu1 %v220_v20  ;;  %964 = vmatpush3.bf16.msra.mxu0 %v1054_v21 }
  0x32   : >> { %984 = vmatpush3.bf16.msra.mxu1 %v1055_v22  ;;  %965 = vmatprep.subr.bf16.mxu0 %v1102_v3 }
  0x33   : >> { %985 = vmatprep.subr.bf16.mxu1 %v1102_v3  ;;  %979 = vmatprep.mubr.msk.bf16.mxu0 %vm1103_vm0, %v1102_v3 }
  0x34   : >> { %999 = vmatprep.mubr.msk.bf16.mxu1 %vm1103_vm0, %v1102_v3 }
  0x35   : >> { %966 = vmatpush3.bf16.msra.mxu0 %v1056_v23 }
  0x36   : >> { %986 = vmatpush3.bf16.msra.mxu1 %v1057_v24  ;;  %967 = vmatprep.subr.bf16.mxu0 %v1102_v3 }
  0x37   : >> { %987 = vmatprep.subr.bf16.mxu1 %v1102_v3 }
  0x39   : >> { %968 = vmatpush3.bf16.msra.mxu0 %v1058_v25 }
  0x3a   : >> { %988 = vmatpush3.bf16.msra.mxu1 %v1059_v26  ;;  %969 = vmatprep.subr.bf16.mxu0 %v1102_v3 }
  0x3b   : >> { %989 = vmatprep.subr.bf16.mxu1 %v1102_v3 }
  0x3d   : >> { %970 = vmatpush3.bf16.msra.mxu0 %v1060_v27 }
  0x3e   : >> { %990 = vmatpush3.bf16.msra.mxu1 %v1061_v28  ;;  %971 = vmatprep.subr.bf16.mxu0 %v1102_v3 }
  0x3f   : >> { %991 = vmatprep.subr.bf16.mxu1 %v1102_v3 }
  0x41   : >> { %972 = vmatpush3.bf16.msra.mxu0 %v1062_v29 }
  0x42   : >> { %992 = vmatpush3.bf16.msra.mxu1 %v1063_v30  ;;  %973 = vmatprep.subr.bf16.mxu0 %v1102_v3 }
  0x43   : >> { %993 = vmatprep.subr.bf16.mxu1 %v1102_v3 }
  0x45   : >> { %974 = vmatpush3.bf16.msra.mxu0 %v1064_v31 }
  0x46   : >> { %994 = vmatpush3.bf16.msra.mxu1 %v1065_v32  ;;  %975 = vmatprep.subr.bf16.mxu0 %v1102_v3 }
  0x47   : >> { %995 = vmatprep.subr.bf16.mxu1 %v1102_v3 }
  0x49   : >> { %976 = vmatpush3.bf16.msra.mxu0 %v1066_v33 }
  0x4a   : >> { %996 = vmatpush3.bf16.msra.mxu1 %v1067_v34  ;;  %977 = vmatprep.subr.bf16.mxu0 %v1102_v3 }
  0x4b   : >> { %997 = vmatprep.subr.bf16.mxu1 %v1102_v3 }
  0x4d   : >> { %978 = vmatpush3.bf16.msra.mxu0 %v1068_v35 }
  0x4e   : >> { %998 = vmatpush3.bf16.msra.mxu1 %v1069_v36 }
  0x50   : >> { %980 = vmatmul.mubr.bf16.vlgmr.msra.gmra.mxu0 %v835_v37 }
  0x51   : >> { %1000 = vmatmul.mubr.bf16.vlgmr.msra.gmra.mxu1 %v860_v38 }
  0xf0   : >> { %v339_v39 = vpop.f32.mrf.mxu0 }
  0xf1   : >> { %v427_v40 = vpop.f32.mrf.mxu1 }
  0xf2   : >> { %v941_v41 = vpop.f32.mrf.mxu0  ;;  %v428_v47 = vadd.f32 %v427_v40, %v339_v39 }
  0xf3   : >> { %v961_v42 = vpop.f32.mrf.mxu1 }
  0xf4   : >> { %v342_v43 = vpop.f32.mrf.mxu0 }
  0xf5   : >> { %v430_v44 = vpop.f32.mrf.mxu1 }
  0xf6   : >> { %v942_v45 = vpop.f32.mrf.mxu0 }
  0xf7   : >> { %v962_v46 = vpop.f32.mrf.mxu1 }
 0x110   : >> { %v535_v48 = vpop.f32.mrf.mxu0 }
 0x111   : >> { %v541_v49 = vadd.f32 %v535_v48, %v428_v47  ;;  %v644_v50 = vpop.f32.mrf.mxu1 }
 0x112   : >> { %v981_v51 = vpop.f32.mrf.mxu0 }
 0x113   : >> { %v650_v52 = vadd.f32 %v644_v50, %v541_v49  ;;  %v1001_v53 = vpop.f32.mrf.mxu1 }
 0x114   : >> { %v538_v54 = vpop.f32.mrf.mxu0 }
 0x115   : >> { %v651_v55 = vpack.c.bf16 %v650_v52, %v650_v52  ;;  %v655_v56 = vsel %vm654_vm1, %v650_v52, 0.0  ;;  %v663_v57 = vmul.f32 %v650_v52, %v650_v52  ;;  %v647_v58 = vpop.f32.mrf.mxu1 }
 0x116   : >> { %v656_v59 = vrot.slane %v655_v56, 4  ;;  %v982_v60 = vpop.f32.mrf.mxu0 }
 0x117   : >> { %653 = vst [vmem:[%s652_s17] sm:$0x1] %v651_v55  ;;  %v664_v61 = vsel %vm654_vm1, %v663_v57, 0.0  ;;  %v1002_v62 = vpop.f32.mrf.mxu1 }
 0x118   : >> { %v657_v63 = vadd.f32 %v656_v59, %v655_v56  ;;  %v665_v2 = vrot.slane %v664_v61, 4 }
 0x11a   : >> { %v658_v3 = vrot.slane %v657_v63, 2  ;;  %v666_v4 = vadd.f32 %v665_v2, %v664_v61 }
 0x11c   : >> { %v659_v5 = vadd.f32 %v658_v3, %v657_v63  ;;  %v667_v6 = vrot.slane %v666_v4, 2 }
 0x11e   : >> { %v660_v7 = vrot.slane %v659_v5, 1  ;;  %v668_v8 = vadd.f32 %v667_v6, %v666_v4 }
 0x120   : >> { %v661_v9 = vadd.f32 %v660_v7, %v659_v5  ;;  %v669_v10 = vrot.slane %v668_v8, 1 }
 0x122   : >> { %v662_v11 = vadd.f32 %v1096_v1, %v661_v9   ;;  %v670_v12 = vadd.f32 %v669_v10, %v668_v8  ;;  %215 = sbr.rel (!%p213_p4) target bundleno = 15 (0xf), region = 97 }
 0x124   : >> { %v671_v13 = vadd.f32 %v1092_v0, %v670_v12   ;;  %v1348_v1 = vmov %v662_v11  ;;  %672 = vst [vmem:[%s206_s24] sm:$0x1] (%p213_p4), %v662_v11 }
 0x126   : >> { %v1347_v0 = vmov %v671_v13  ;;  %673 = vst [vmem:[%s209_s30] sm:$0x1] (%p213_p4), %v671_v13 }
 0x127 PF: > { %s15_s15 = sadd.s32 1, %s1088_s15  }
 0x128   : > { %p12_p5 = scmp.ge.s32.totalorder %s15_s15, 4  }
 0x12a   :  { %14 = sbr.rel (!%p12_p5) target bundleno = 1 (0x1), region = 108 }

</bundles_post_ra>
